<compile_context>
chip_gen: v7x
topology: tpu7x:2x2x1
jax: 0.10.0
libtpu: 0.0.40
codegen_flags: <defaults>
</compile_context>

<pallas_src>
import math

import jax
import jax.numpy as jnp
from jax.experimental import pallas as pl
from jax.experimental.pallas import tpu as pltpu

FEAT = 8                      # feature_dim
LOCAL = 16                    # local_info_dim
GLOBAL = 16                   # global_info_dim
HID = LOCAL + GLOBAL          # 32  (conv1..7 output channels)
CAT = FEAT + HID              # 40  (conv2..8 input channels)
N_MID_LAYERS = 6              # conv2 .. conv7
SLAB_ROWS = 48                # packed-parameter slab (multiple of 8 sublanes)
SLAB_COLS = 8                 # col 0: b1, cols 1..6: bm[i], col 7: [w8 ; b8]


def risnet_kernel(x_ref, s_ref, st_ref, w1_ref, wxall_ref, wml_ref, wmg_ref,
                  slab_ref, out_ref):
    # x_ref:     (FEAT, BN)        channels-major slab (compute dtype)
    # s_ref:     (BN, bb_pad) f32  segment matrix: 1/N on valid lanes, else 0
    # st_ref:    (bb_pad, BN) f32  one-hot broadcast matrix
    # w1_ref:    (HID, FEAT)       conv1 weight (compute dtype)
    # wxall_ref: (6*HID, FEAT)     stacked conv2..7 x-branch weights
    # wml_ref:   (6, HID, LOCAL)   conv2..7 local-branch weights
    # wmg_ref:   (6, HID, GLOBAL)  conv2..7 global-branch weights
    # slab_ref:  (48, 8) f32       packed biases + conv8 weight row + b8
    # out_ref:   (1, BN) f32
    cd = w1_ref.dtype
    x = x_ref[...]
    s = s_ref[...]
    st = st_ref[...]
    slab = slab_ref[...]

    b1 = slab[0:HID, 0:1]                        # (32, 1)
    w8x = slab[0:FEAT, 7:8]                      # (8, 1)
    w8l = slab[FEAT:FEAT + LOCAL, 7:8]           # (16, 1)
    w8g = slab[FEAT + LOCAL:CAT, 7:8]            # (16, 1)
    b8 = slab[CAT:CAT + 1, 7:8]                  # (1, 1)

    def seg_mean(h):
        # Per-batch mean of the last GLOBAL channels, broadcast back to every
        # lane of the same batch element.  Two tiny rank-bb_pad f32 matmuls
        # replace the old dense (BN, BN) matmul; S already carries the exact
        # f32 1/N scale and zeros out any padded lanes.
        means = jnp.dot(h[HID - GLOBAL:, :], s,
                        preferred_element_type=jnp.float32)       # (16, bb_pad)
        return jnp.dot(means, st,
                       preferred_element_type=jnp.float32)        # (16, BN)

    # conv1 + relu (f32 accumulation).
    h = jnp.dot(w1_ref[...], x, preferred_element_type=jnp.float32) + b1
    h = jnp.maximum(h, 0.0)

    # Loop-invariant x-branch of conv2..7: one (192, 8) @ (8, BN) matmul.
    zx_all = jnp.dot(wxall_ref[...], x, preferred_element_type=jnp.float32)

    # conv2 .. conv7:  W @ [x; local; global] == Wx@x + Wl@local + Wg@g.
    for i in range(N_MID_LAYERS):
        lc = h[:LOCAL, :].astype(cd)
        gc = seg_mean(h).astype(cd)
        z = zx_all[i * HID:(i + 1) * HID, :]
        z = z + jnp.dot(wml_ref[i], lc, preferred_element_type=jnp.float32)
        z = z + jnp.dot(wmg_ref[i], gc, preferred_element_type=jnp.float32)
        h = jnp.maximum(z + slab[0:HID, 1 + i:2 + i], 0.0)

    # conv8: single-row matvec -> VPU scale + sublane reduce (no M=1 MXU push).
    g = seg_mean(h)
    xf = x.astype(jnp.float32)
    out = (jnp.sum(w8x * xf, axis=0, keepdims=True)
           + jnp.sum(w8l * h[:LOCAL, :], axis=0, keepdims=True)
           + jnp.sum(w8g * g, axis=0, keepdims=True)
           + b8)
    out_ref[...] = out.astype(out_ref.dtype)


def _round_up(x, m):
    return ((x + m - 1) // m) * m


def _choose_tiling(B, N, max_lanes, block_b=None):
    """Pick (block_b, n_pad): per-step lane width block_b*n_pad is a multiple
    of 128 (unmasked stores), fits max_lanes, and leaves >= 2 grid steps when
    possible so v7x's two TensorCores both get work."""
    if block_b is not None:
        assert B % block_b == 0, "block_b must divide the batch"
        n_pad = _round_up(N, 128 // math.gcd(block_b, 128))
        return block_b, n_pad
    for n_pad in (N, _round_up(N, 8), _round_up(N, 128)):
        cands = [bb for bb in range(1, B + 1)
                 if B % bb == 0 and (bb * n_pad) % 128 == 0
                 and bb * n_pad <= max_lanes]
        if cands:
            multi = [bb for bb in cands if B // bb >= 2]
            return max(multi if multi else cands), n_pad
    # Last resort: one batch element per step, antenna axis padded to 128.
    # TODO(synk): also tile the antenna axis when one element exceeds max_lanes.
    return 1, _round_up(N, 128)


def _prepare_params(params, use_bf16):
    w1, b1, wm, bm, w8, b8 = params
    wd = jnp.bfloat16 if use_bf16 else jnp.float32
    wxall = wm[:, :, :FEAT].reshape(N_MID_LAYERS * HID, FEAT).astype(wd)
    wml = wm[:, :, FEAT:FEAT + LOCAL].astype(wd)
    wmg = wm[:, :, FEAT + LOCAL:].astype(wd)
    slab = jnp.zeros((SLAB_ROWS, SLAB_COLS), jnp.float32)
    slab = slab.at[0:HID, 0].set(b1[:, 0].astype(jnp.float32))
    slab = slab.at[0:HID, 1:1 + N_MID_LAYERS].set(
        jnp.transpose(bm[:, :, 0]).astype(jnp.float32))
    slab = slab.at[0:CAT, 7].set(w8[0, :].astype(jnp.float32))
    slab = slab.at[CAT, 7].set(jnp.asarray(b8, jnp.float32).reshape(()))
    return w1.astype(wd), wxall, wml, wmg, slab


def risnet_forward(channel, params, *, block_b=None, max_lanes=4096,
                   use_bf16=True):
    """channel: (B, FEAT, N) float32 -> (B, 1, N) float32 (PyTorch RISNet)."""
    B, C, N = channel.shape
    assert C == FEAT
    block_b, n_pad = _choose_tiling(B, N, max_lanes, block_b)
    BN = block_b * n_pad
    bb_pad = _round_up(block_b, 8)        # lane-pad the tiny segment axis
    grid = (B // block_b,)
    cd = jnp.bfloat16 if use_bf16 else jnp.float32

    # Channels-major lane-dense slab: lane = b * n_pad + antenna (zero-padded).
    x = channel.astype(jnp.float32)
    if n_pad != N:
        x = jnp.pad(x, ((0, 0), (0, 0), (0, n_pad - N)))
    x_slab = jnp.transpose(x, (1, 0, 2)).reshape(FEAT, B * n_pad).astype(cd)

    # Factorized per-batch averaging: S carries the exact f32 1/N scale and a
    # padded-lane mask; S^T broadcasts the per-batch means back to lanes.
    lane = jnp.arange(BN)
    seg = lane // n_pad
    valid = (lane % n_pad) < N
    onehot = seg[:, None] == jnp.arange(bb_pad)[None, :]          # (BN, bb_pad)
    s_mat = jnp.where(onehot & valid[:, None], 1.0 / N, 0.0).astype(jnp.float32)
    st_mat = onehot.T.astype(jnp.float32)                         # (bb_pad, BN)

    w1, wxall, wml, wmg, slab = _prepare_params(params, use_bf16)

    lanes_total = B * n_pad
    itemsize = 2 if use_bf16 else 4
    cost = pl.CostEstimate(
        flops=(2 * lanes_total * (HID * FEAT + N_MID_LAYERS * HID * CAT + CAT)
               + 7 * 4 * GLOBAL * bb_pad * lanes_total),
        transcendentals=0,
        bytes_accessed=(FEAT * lanes_total * itemsize + lanes_total * 4
                        + (s_mat.size + st_mat.size + slab.size) * 4
                        + (w1.size + wxall.size + wml.size + wmg.size)
                        * itemsize))

    out_slab = pl.pallas_call(
        risnet_kernel,
        out_shape=jax.ShapeDtypeStruct((1, lanes_total), jnp.float32),
        grid=grid,
        in_specs=[
            pl.BlockSpec((FEAT, BN), lambda i: (0, i)),                      # x
            pl.BlockSpec((BN, bb_pad), lambda i: (0, 0)),                    # S
            pl.BlockSpec((bb_pad, BN), lambda i: (0, 0)),                    # S^T
            pl.BlockSpec((HID, FEAT), lambda i: (0, 0)),                     # w1
            pl.BlockSpec((N_MID_LAYERS * HID, FEAT), lambda i: (0, 0)),      # Wx all
            pl.BlockSpec((N_MID_LAYERS, HID, LOCAL), lambda i: (0, 0, 0)),   # Wl
            pl.BlockSpec((N_MID_LAYERS, HID, GLOBAL), lambda i: (0, 0, 0)),  # Wg
            pl.BlockSpec((SLAB_ROWS, SLAB_COLS), lambda i: (0, 0)),          # biases/w8
        ],
        out_specs=pl.BlockSpec((1, BN), lambda i: (0, i)),
        compiler_params=pltpu.CompilerParams(
            dimension_semantics=("parallel",)),   # batch tiles are independent
        cost_estimate=cost,
    )(x_slab, s_mat, st_mat, w1, wxall, wml, wmg, slab)

    return out_slab.reshape(B, n_pad)[:, :N][:, None, :]


def risnet_reference(channel, params, compute_dtype=jnp.float32):
    """Plain-JAX reference.  compute_dtype=float32 reproduces the PyTorch
    forward; bfloat16 mirrors the kernel's MXU-operand / x-DMA precision."""
    w1, b1, wm, bm, w8, b8 = params
    cd = compute_dtype
    B, _, N = channel.shape
    x = channel.astype(cd).astype(jnp.float32)   # mirrors the kernel's x DMA dtype

    def dot(w, a):
        return jnp.einsum('oi,bin->bon', w.astype(cd), a.astype(cd),
                          preferred_element_type=jnp.float32)

    def gmean(h):
        g = jnp.mean(h[:, HID - GLOBAL:, :], axis=2, keepdims=True)
        return jnp.broadcast_to(g, (B, GLOBAL, N))

    h = jax.nn.relu(dot(w1, x) + b1[None])
    for i in range(N_MID_LAYERS):
        z = (dot(wm[i, :, :FEAT], x)
             + dot(wm[i, :, FEAT:FEAT + LOCAL], h[:, :LOCAL, :])
             + dot(wm[i, :, FEAT + LOCAL:], gmean(h))
             + bm[i][None])
        h = jax.nn.relu(z)
    g = gmean(h)
    out = (jnp.einsum('oi,bin->bon', w8[:, :FEAT], x)
           + jnp.einsum('oi,bin->bon', w8[:, FEAT:FEAT + LOCAL], h[:, :LOCAL, :])
           + jnp.einsum('oi,bin->bon', w8[:, FEAT + LOCAL:], g)
           + b8[None])
    return out


def init_params(key):
    ks = jax.random.split(key, 6)
    w1 = jax.random.normal(ks[0], (HID, FEAT), jnp.float32) * 0.2
    b1 = jax.random.normal(ks[1], (HID, 1), jnp.float32) * 0.05
    wm = jax.random.normal(ks[2], (N_MID_LAYERS, HID, CAT), jnp.float32) * 0.1
    bm = jax.random.normal(ks[3], (N_MID_LAYERS, HID, 1), jnp.float32) * 0.05
    w8 = jax.random.normal(ks[4], (1, CAT), jnp.float32) * 0.1
    b8 = jax.random.normal(ks[5], (1, 1), jnp.float32) * 0.05
    return (w1, b1, wm, bm, w8, b8)


if __name__ == "__main__":
    key = jax.random.PRNGKey(0)
    k_param, k_in = jax.random.split(key)
    params = init_params(k_param)

    B, N = 4, 64   # small demo: picks block_b=2 -> two 128-lane grid steps
    channel = jax.random.normal(k_in, (B, FEAT, N), jnp.float32)

    fwd = jax.jit(risnet_forward,
                  static_argnames=("block_b", "max_lanes", "use_bf16"))

    # Fast path: bf16 MXU operands, f32 accumulation.
    out = jax.block_until_ready(fwd(channel, params, use_bf16=True))
    assert out.shape == (B, 1, N)
    ref_matched = risnet_reference(channel, params, compute_dtype=jnp.bfloat16)
    assert jnp.allclose(out, ref_matched, atol=2e-2, rtol=2e-2), \
        "mismatch vs bf16-matched reference"
    ref_f32 = risnet_reference(channel, params, compute_dtype=jnp.float32)
    assert jnp.allclose(out, ref_f32, atol=1e-1, rtol=1e-1), \
        "mismatch vs f32 reference"

    # Parity path: full f32, matches the PyTorch-faithful reference tightly.
    out_f32 = jax.block_until_ready(fwd(channel, params, use_bf16=False))
    assert jnp.allclose(out_f32, ref_f32, atol=1e-3, rtol=1e-3), \
        "f32 kernel mismatch vs f32 reference"

    print("KERNEL_OK")
</pallas_src>

<mosaic_0001>
module attributes {stable_mosaic.version = 11 : i64} {
  func.func @risnet_kernel(%arg0: i32, %arg1: memref<8x128xbf16, #tpu.memory_space<vmem>>, %arg2: memref<128x8xf32, #tpu.memory_space<vmem>>, %arg3: memref<8x128xf32, #tpu.memory_space<vmem>>, %arg4: memref<32x8xbf16, #tpu.memory_space<vmem>>, %arg5: memref<192x8xbf16, #tpu.memory_space<vmem>>, %arg6: memref<6x32x16xbf16, #tpu.memory_space<vmem>>, %arg7: memref<6x32x16xbf16, #tpu.memory_space<vmem>>, %arg8: memref<48x8xf32, #tpu.memory_space<vmem>>, %arg9: memref<1x128xf32, #tpu.memory_space<vmem>>) attributes {dimension_semantics = [#tpu.dimension_semantics<parallel>], iteration_bounds = array<i64: 2>, scalar_prefetch = 0 : i64, scratch_operands = 0 : i64, tpu.core_type = #tpu.core_type<tc>, window_params = [{transform_indices = @transform_0, window_bounds = array<i64: 8, 128>}, {pipeline_mode = #tpu.pipeline_mode<synchronous>, transform_indices = @transform_1, window_bounds = array<i64: 128, 8>}, {pipeline_mode = #tpu.pipeline_mode<synchronous>, transform_indices = @transform_2, window_bounds = array<i64: 8, 128>}, {pipeline_mode = #tpu.pipeline_mode<synchronous>, transform_indices = @transform_3, window_bounds = array<i64: 32, 8>}, {pipeline_mode = #tpu.pipeline_mode<synchronous>, transform_indices = @transform_4, window_bounds = array<i64: 192, 8>}, {pipeline_mode = #tpu.pipeline_mode<synchronous>, transform_indices = @transform_5, window_bounds = array<i64: 6, 32, 16>}, {pipeline_mode = #tpu.pipeline_mode<synchronous>, transform_indices = @transform_6, window_bounds = array<i64: 6, 32, 16>}, {pipeline_mode = #tpu.pipeline_mode<synchronous>, transform_indices = @transform_7, window_bounds = array<i64: 48, 8>}, {transform_indices = @transform_8, window_bounds = array<i64: 1, 128>}]} {
    %c0 = arith.constant 0 : index
    %c0_0 = arith.constant 0 : index
    %0 = vector.load %arg1[%c0, %c0_0] : memref<8x128xbf16, #tpu.memory_space<vmem>>, vector<8x128xbf16>
    %c0_1 = arith.constant 0 : index
    %c0_2 = arith.constant 0 : index
    %1 = vector.load %arg2[%c0_1, %c0_2] : memref<128x8xf32, #tpu.memory_space<vmem>>, vector<128x8xf32>
    %c0_3 = arith.constant 0 : index
    %c0_4 = arith.constant 0 : index
    %2 = vector.load %arg3[%c0_3, %c0_4] : memref<8x128xf32, #tpu.memory_space<vmem>>, vector<8x128xf32>
    %c0_5 = arith.constant 0 : index
    %c0_6 = arith.constant 0 : index
    %3 = vector.load %arg8[%c0_5, %c0_6] : memref<48x8xf32, #tpu.memory_space<vmem>>, vector<48x8xf32>
    %4 = vector.extract_strided_slice %3 {offsets = [0, 0], sizes = [32, 1], strides = [1, 1]} : vector<48x8xf32> to vector<32x1xf32>
    %5 = vector.extract_strided_slice %3 {offsets = [0, 7], sizes = [8, 1], strides = [1, 1]} : vector<48x8xf32> to vector<8x1xf32>
    %6 = vector.extract_strided_slice %3 {offsets = [8, 7], sizes = [16, 1], strides = [1, 1]} : vector<48x8xf32> to vector<16x1xf32>
    %7 = vector.extract_strided_slice %3 {offsets = [24, 7], sizes = [16, 1], strides = [1, 1]} : vector<48x8xf32> to vector<16x1xf32>
    %8 = vector.extract_strided_slice %3 {offsets = [40, 7], sizes = [1, 1], strides = [1, 1]} : vector<48x8xf32> to vector<1x1xf32>
    %c0_7 = arith.constant 0 : index
    %c0_8 = arith.constant 0 : index
    %9 = vector.load %arg4[%c0_7, %c0_8] : memref<32x8xbf16, #tpu.memory_space<vmem>>, vector<32x8xbf16>
    %cst = arith.constant dense<0.000000e+00> : vector<32x128xf32>
    %10 = tpu.matmul %9, %0, %cst {dimension_numbers = #tpu.dot_dimension_numbers<[1], [0], [0], [1], [0, 0, 1, 1], [], []>} : vector<32x8xbf16>, vector<8x128xbf16>, vector<32x128xf32> -> vector<32x128xf32>
    %11 = vector.broadcast %4 : vector<32x1xf32> to vector<32x128xf32>
    %12 = arith.addf %10, %11 : vector<32x128xf32>
    %cst_9 = arith.constant 0.000000e+00 : f32
    %13 = vector.broadcast %cst_9 : f32 to vector<32x128xf32>
    %14 = arith.maximumf %12, %13 : vector<32x128xf32>
    %c0_10 = arith.constant 0 : index
    %c0_11 = arith.constant 0 : index
    %15 = vector.load %arg5[%c0_10, %c0_11] : memref<192x8xbf16, #tpu.memory_space<vmem>>, vector<192x8xbf16>
    %cst_12 = arith.constant dense<0.000000e+00> : vector<192x128xf32>
    %16 = tpu.matmul %15, %0, %cst_12 {dimension_numbers = #tpu.dot_dimension_numbers<[1], [0], [0], [1], [0, 0, 1, 1], [], []>} : vector<192x8xbf16>, vector<8x128xbf16>, vector<192x128xf32> -> vector<192x128xf32>
    %17 = vector.extract_strided_slice %14 {offsets = [0, 0], sizes = [16, 128], strides = [1, 1]} : vector<32x128xf32> to vector<16x128xf32>
    %18 = arith.truncf %17 : vector<16x128xf32> to vector<16x128xbf16>
    %19 = vector.extract_strided_slice %14 {offsets = [16, 0], sizes = [16, 128], strides = [1, 1]} : vector<32x128xf32> to vector<16x128xf32>
    %cst_13 = arith.constant dense<0.000000e+00> : vector<16x8xf32>
    %20 = tpu.matmul %19, %1, %cst_13 {dimension_numbers = #tpu.dot_dimension_numbers<[1], [0], [0], [1], [0, 0, 1, 1], [], []>} : vector<16x128xf32>, vector<128x8xf32>, vector<16x8xf32> -> vector<16x8xf32>
    %cst_14 = arith.constant dense<0.000000e+00> : vector<16x128xf32>
    %21 = tpu.matmul %20, %2, %cst_14 {dimension_numbers = #tpu.dot_dimension_numbers<[1], [0], [0], [1], [0, 0, 1, 1], [], []>} : vector<16x8xf32>, vector<8x128xf32>, vector<16x128xf32> -> vector<16x128xf32>
    %22 = arith.truncf %21 : vector<16x128xf32> to vector<16x128xbf16>
    %23 = vector.extract_strided_slice %16 {offsets = [0, 0], sizes = [32, 128], strides = [1, 1]} : vector<192x128xf32> to vector<32x128xf32>
    %c0_15 = arith.constant 0 : index
    %c0_16 = arith.constant 0 : index
    %c0_17 = arith.constant 0 : index
    %24 = vector.load %arg6[%c0_15, %c0_16, %c0_17] : memref<6x32x16xbf16, #tpu.memory_space<vmem>>, vector<1x32x16xbf16>
    %25 = vector.shape_cast %24 : vector<1x32x16xbf16> to vector<32x16xbf16>
    %cst_18 = arith.constant dense<0.000000e+00> : vector<32x128xf32>
    %26 = tpu.matmul %25, %18, %cst_18 {dimension_numbers = #tpu.dot_dimension_numbers<[1], [0], [0], [1], [0, 0, 1, 1], [], []>} : vector<32x16xbf16>, vector<16x128xbf16>, vector<32x128xf32> -> vector<32x128xf32>
    %27 = arith.addf %23, %26 : vector<32x128xf32>
    %c0_19 = arith.constant 0 : index
    %c0_20 = arith.constant 0 : index
    %c0_21 = arith.constant 0 : index
    %28 = vector.load %arg7[%c0_19, %c0_20, %c0_21] : memref<6x32x16xbf16, #tpu.memory_space<vmem>>, vector<1x32x16xbf16>
    %29 = vector.shape_cast %28 : vector<1x32x16xbf16> to vector<32x16xbf16>
    %cst_22 = arith.constant dense<0.000000e+00> : vector<32x128xf32>
    %30 = tpu.matmul %29, %22, %cst_22 {dimension_numbers = #tpu.dot_dimension_numbers<[1], [0], [0], [1], [0, 0, 1, 1], [], []>} : vector<32x16xbf16>, vector<16x128xbf16>, vector<32x128xf32> -> vector<32x128xf32>
    %31 = arith.addf %27, %30 : vector<32x128xf32>
    %32 = vector.extract_strided_slice %3 {offsets = [0, 1], sizes = [32, 1], strides = [1, 1]} : vector<48x8xf32> to vector<32x1xf32>
    %33 = vector.broadcast %32 : vector<32x1xf32> to vector<32x128xf32>
    %34 = arith.addf %31, %33 : vector<32x128xf32>
    %cst_23 = arith.constant 0.000000e+00 : f32
    %35 = vector.broadcast %cst_23 : f32 to vector<32x128xf32>
    %36 = arith.maximumf %34, %35 : vector<32x128xf32>
    %37 = vector.extract_strided_slice %36 {offsets = [0, 0], sizes = [16, 128], strides = [1, 1]} : vector<32x128xf32> to vector<16x128xf32>
    %38 = arith.truncf %37 : vector<16x128xf32> to vector<16x128xbf16>
    %39 = vector.extract_strided_slice %36 {offsets = [16, 0], sizes = [16, 128], strides = [1, 1]} : vector<32x128xf32> to vector<16x128xf32>
    %cst_24 = arith.constant dense<0.000000e+00> : vector<16x8xf32>
    %40 = tpu.matmul %39, %1, %cst_24 {dimension_numbers = #tpu.dot_dimension_numbers<[1], [0], [0], [1], [0, 0, 1, 1], [], []>} : vector<16x128xf32>, vector<128x8xf32>, vector<16x8xf32> -> vector<16x8xf32>
    %cst_25 = arith.constant dense<0.000000e+00> : vector<16x128xf32>
    %41 = tpu.matmul %40, %2, %cst_25 {dimension_numbers = #tpu.dot_dimension_numbers<[1], [0], [0], [1], [0, 0, 1, 1], [], []>} : vector<16x8xf32>, vector<8x128xf32>, vector<16x128xf32> -> vector<16x128xf32>
    %42 = arith.truncf %41 : vector<16x128xf32> to vector<16x128xbf16>
    %43 = vector.extract_strided_slice %16 {offsets = [32, 0], sizes = [32, 128], strides = [1, 1]} : vector<192x128xf32> to vector<32x128xf32>
    %c1 = arith.constant 1 : index
    %c0_26 = arith.constant 0 : index
    %c0_27 = arith.constant 0 : index
    %44 = vector.load %arg6[%c1, %c0_26, %c0_27] : memref<6x32x16xbf16, #tpu.memory_space<vmem>>, vector<1x32x16xbf16>
    %45 = vector.shape_cast %44 : vector<1x32x16xbf16> to vector<32x16xbf16>
    %cst_28 = arith.constant dense<0.000000e+00> : vector<32x128xf32>
    %46 = tpu.matmul %45, %38, %cst_28 {dimension_numbers = #tpu.dot_dimension_numbers<[1], [0], [0], [1], [0, 0, 1, 1], [], []>} : vector<32x16xbf16>, vector<16x128xbf16>, vector<32x128xf32> -> vector<32x128xf32>
    %47 = arith.addf %43, %46 : vector<32x128xf32>
    %c1_29 = arith.constant 1 : index
    %c0_30 = arith.constant 0 : index
    %c0_31 = arith.constant 0 : index
    %48 = vector.load %arg7[%c1_29, %c0_30, %c0_31] : memref<6x32x16xbf16, #tpu.memory_space<vmem>>, vector<1x32x16xbf16>
    %49 = vector.shape_cast %48 : vector<1x32x16xbf16> to vector<32x16xbf16>
    %cst_32 = arith.constant dense<0.000000e+00> : vector<32x128xf32>
    %50 = tpu.matmul %49, %42, %cst_32 {dimension_numbers = #tpu.dot_dimension_numbers<[1], [0], [0], [1], [0, 0, 1, 1], [], []>} : vector<32x16xbf16>, vector<16x128xbf16>, vector<32x128xf32> -> vector<32x128xf32>
    %51 = arith.addf %47, %50 : vector<32x128xf32>
    %52 = vector.extract_strided_slice %3 {offsets = [0, 2], sizes = [32, 1], strides = [1, 1]} : vector<48x8xf32> to vector<32x1xf32>
    %53 = vector.broadcast %52 : vector<32x1xf32> to vector<32x128xf32>
    %54 = arith.addf %51, %53 : vector<32x128xf32>
    %cst_33 = arith.constant 0.000000e+00 : f32
    %55 = vector.broadcast %cst_33 : f32 to vector<32x128xf32>
    %56 = arith.maximumf %54, %55 : vector<32x128xf32>
    %57 = vector.extract_strided_slice %56 {offsets = [0, 0], sizes = [16, 128], strides = [1, 1]} : vector<32x128xf32> to vector<16x128xf32>
    %58 = arith.truncf %57 : vector<16x128xf32> to vector<16x128xbf16>
    %59 = vector.extract_strided_slice %56 {offsets = [16, 0], sizes = [16, 128], strides = [1, 1]} : vector<32x128xf32> to vector<16x128xf32>
    %cst_34 = arith.constant dense<0.000000e+00> : vector<16x8xf32>
    %60 = tpu.matmul %59, %1, %cst_34 {dimension_numbers = #tpu.dot_dimension_numbers<[1], [0], [0], [1], [0, 0, 1, 1], [], []>} : vector<16x128xf32>, vector<128x8xf32>, vector<16x8xf32> -> vector<16x8xf32>
    %cst_35 = arith.constant dense<0.000000e+00> : vector<16x128xf32>
    %61 = tpu.matmul %60, %2, %cst_35 {dimension_numbers = #tpu.dot_dimension_numbers<[1], [0], [0], [1], [0, 0, 1, 1], [], []>} : vector<16x8xf32>, vector<8x128xf32>, vector<16x128xf32> -> vector<16x128xf32>
    %62 = arith.truncf %61 : vector<16x128xf32> to vector<16x128xbf16>
    %63 = vector.extract_strided_slice %16 {offsets = [64, 0], sizes = [32, 128], strides = [1, 1]} : vector<192x128xf32> to vector<32x128xf32>
    %c2 = arith.constant 2 : index
    %c0_36 = arith.constant 0 : index
    %c0_37 = arith.constant 0 : index
    %64 = vector.load %arg6[%c2, %c0_36, %c0_37] : memref<6x32x16xbf16, #tpu.memory_space<vmem>>, vector<1x32x16xbf16>
    %65 = vector.shape_cast %64 : vector<1x32x16xbf16> to vector<32x16xbf16>
    %cst_38 = arith.constant dense<0.000000e+00> : vector<32x128xf32>
    %66 = tpu.matmul %65, %58, %cst_38 {dimension_numbers = #tpu.dot_dimension_numbers<[1], [0], [0], [1], [0, 0, 1, 1], [], []>} : vector<32x16xbf16>, vector<16x128xbf16>, vector<32x128xf32> -> vector<32x128xf32>
    %67 = arith.addf %63, %66 : vector<32x128xf32>
    %c2_39 = arith.constant 2 : index
    %c0_40 = arith.constant 0 : index
    %c0_41 = arith.constant 0 : index
    %68 = vector.load %arg7[%c2_39, %c0_40, %c0_41] : memref<6x32x16xbf16, #tpu.memory_space<vmem>>, vector<1x32x16xbf16>
    %69 = vector.shape_cast %68 : vector<1x32x16xbf16> to vector<32x16xbf16>
    %cst_42 = arith.constant dense<0.000000e+00> : vector<32x128xf32>
    %70 = tpu.matmul %69, %62, %cst_42 {dimension_numbers = #tpu.dot_dimension_numbers<[1], [0], [0], [1], [0, 0, 1, 1], [], []>} : vector<32x16xbf16>, vector<16x128xbf16>, vector<32x128xf32> -> vector<32x128xf32>
    %71 = arith.addf %67, %70 : vector<32x128xf32>
    %72 = vector.extract_strided_slice %3 {offsets = [0, 3], sizes = [32, 1], strides = [1, 1]} : vector<48x8xf32> to vector<32x1xf32>
    %73 = vector.broadcast %72 : vector<32x1xf32> to vector<32x128xf32>
    %74 = arith.addf %71, %73 : vector<32x128xf32>
    %cst_43 = arith.constant 0.000000e+00 : f32
    %75 = vector.broadcast %cst_43 : f32 to vector<32x128xf32>
    %76 = arith.maximumf %74, %75 : vector<32x128xf32>
    %77 = vector.extract_strided_slice %76 {offsets = [0, 0], sizes = [16, 128], strides = [1, 1]} : vector<32x128xf32> to vector<16x128xf32>
    %78 = arith.truncf %77 : vector<16x128xf32> to vector<16x128xbf16>
    %79 = vector.extract_strided_slice %76 {offsets = [16, 0], sizes = [16, 128], strides = [1, 1]} : vector<32x128xf32> to vector<16x128xf32>
    %cst_44 = arith.constant dense<0.000000e+00> : vector<16x8xf32>
    %80 = tpu.matmul %79, %1, %cst_44 {dimension_numbers = #tpu.dot_dimension_numbers<[1], [0], [0], [1], [0, 0, 1, 1], [], []>} : vector<16x128xf32>, vector<128x8xf32>, vector<16x8xf32> -> vector<16x8xf32>
    %cst_45 = arith.constant dense<0.000000e+00> : vector<16x128xf32>
    %81 = tpu.matmul %80, %2, %cst_45 {dimension_numbers = #tpu.dot_dimension_numbers<[1], [0], [0], [1], [0, 0, 1, 1], [], []>} : vector<16x8xf32>, vector<8x128xf32>, vector<16x128xf32> -> vector<16x128xf32>
    %82 = arith.truncf %81 : vector<16x128xf32> to vector<16x128xbf16>
    %83 = vector.extract_strided_slice %16 {offsets = [96, 0], sizes = [32, 128], strides = [1, 1]} : vector<192x128xf32> to vector<32x128xf32>
    %c3 = arith.constant 3 : index
    %c0_46 = arith.constant 0 : index
    %c0_47 = arith.constant 0 : index
    %84 = vector.load %arg6[%c3, %c0_46, %c0_47] : memref<6x32x16xbf16, #tpu.memory_space<vmem>>, vector<1x32x16xbf16>
    %85 = vector.shape_cast %84 : vector<1x32x16xbf16> to vector<32x16xbf16>
    %cst_48 = arith.constant dense<0.000000e+00> : vector<32x128xf32>
    %86 = tpu.matmul %85, %78, %cst_48 {dimension_numbers = #tpu.dot_dimension_numbers<[1], [0], [0], [1], [0, 0, 1, 1], [], []>} : vector<32x16xbf16>, vector<16x128xbf16>, vector<32x128xf32> -> vector<32x128xf32>
    %87 = arith.addf %83, %86 : vector<32x128xf32>
    %c3_49 = arith.constant 3 : index
    %c0_50 = arith.constant 0 : index
    %c0_51 = arith.constant 0 : index
    %88 = vector.load %arg7[%c3_49, %c0_50, %c0_51] : memref<6x32x16xbf16, #tpu.memory_space<vmem>>, vector<1x32x16xbf16>
    %89 = vector.shape_cast %88 : vector<1x32x16xbf16> to vector<32x16xbf16>
    %cst_52 = arith.constant dense<0.000000e+00> : vector<32x128xf32>
    %90 = tpu.matmul %89, %82, %cst_52 {dimension_numbers = #tpu.dot_dimension_numbers<[1], [0], [0], [1], [0, 0, 1, 1], [], []>} : vector<32x16xbf16>, vector<16x128xbf16>, vector<32x128xf32> -> vector<32x128xf32>
    %91 = arith.addf %87, %90 : vector<32x128xf32>
    %92 = vector.extract_strided_slice %3 {offsets = [0, 4], sizes = [32, 1], strides = [1, 1]} : vector<48x8xf32> to vector<32x1xf32>
    %93 = vector.broadcast %92 : vector<32x1xf32> to vector<32x128xf32>
    %94 = arith.addf %91, %93 : vector<32x128xf32>
    %cst_53 = arith.constant 0.000000e+00 : f32
    %95 = vector.broadcast %cst_53 : f32 to vector<32x128xf32>
    %96 = arith.maximumf %94, %95 : vector<32x128xf32>
    %97 = vector.extract_strided_slice %96 {offsets = [0, 0], sizes = [16, 128], strides = [1, 1]} : vector<32x128xf32> to vector<16x128xf32>
    %98 = arith.truncf %97 : vector<16x128xf32> to vector<16x128xbf16>
    %99 = vector.extract_strided_slice %96 {offsets = [16, 0], sizes = [16, 128], strides = [1, 1]} : vector<32x128xf32> to vector<16x128xf32>
    %cst_54 = arith.constant dense<0.000000e+00> : vector<16x8xf32>
    %100 = tpu.matmul %99, %1, %cst_54 {dimension_numbers = #tpu.dot_dimension_numbers<[1], [0], [0], [1], [0, 0, 1, 1], [], []>} : vector<16x128xf32>, vector<128x8xf32>, vector<16x8xf32> -> vector<16x8xf32>
    %cst_55 = arith.constant dense<0.000000e+00> : vector<16x128xf32>
    %101 = tpu.matmul %100, %2, %cst_55 {dimension_numbers = #tpu.dot_dimension_numbers<[1], [0], [0], [1], [0, 0, 1, 1], [], []>} : vector<16x8xf32>, vector<8x128xf32>, vector<16x128xf32> -> vector<16x128xf32>
    %102 = arith.truncf %101 : vector<16x128xf32> to vector<16x128xbf16>
    %103 = vector.extract_strided_slice %16 {offsets = [128, 0], sizes = [32, 128], strides = [1, 1]} : vector<192x128xf32> to vector<32x128xf32>
    %c4 = arith.constant 4 : index
    %c0_56 = arith.constant 0 : index
    %c0_57 = arith.constant 0 : index
    %104 = vector.load %arg6[%c4, %c0_56, %c0_57] : memref<6x32x16xbf16, #tpu.memory_space<vmem>>, vector<1x32x16xbf16>
    %105 = vector.shape_cast %104 : vector<1x32x16xbf16> to vector<32x16xbf16>
    %cst_58 = arith.constant dense<0.000000e+00> : vector<32x128xf32>
    %106 = tpu.matmul %105, %98, %cst_58 {dimension_numbers = #tpu.dot_dimension_numbers<[1], [0], [0], [1], [0, 0, 1, 1], [], []>} : vector<32x16xbf16>, vector<16x128xbf16>, vector<32x128xf32> -> vector<32x128xf32>
    %107 = arith.addf %103, %106 : vector<32x128xf32>
    %c4_59 = arith.constant 4 : index
    %c0_60 = arith.constant 0 : index
    %c0_61 = arith.constant 0 : index
    %108 = vector.load %arg7[%c4_59, %c0_60, %c0_61] : memref<6x32x16xbf16, #tpu.memory_space<vmem>>, vector<1x32x16xbf16>
    %109 = vector.shape_cast %108 : vector<1x32x16xbf16> to vector<32x16xbf16>
    %cst_62 = arith.constant dense<0.000000e+00> : vector<32x128xf32>
    %110 = tpu.matmul %109, %102, %cst_62 {dimension_numbers = #tpu.dot_dimension_numbers<[1], [0], [0], [1], [0, 0, 1, 1], [], []>} : vector<32x16xbf16>, vector<16x128xbf16>, vector<32x128xf32> -> vector<32x128xf32>
    %111 = arith.addf %107, %110 : vector<32x128xf32>
    %112 = vector.extract_strided_slice %3 {offsets = [0, 5], sizes = [32, 1], strides = [1, 1]} : vector<48x8xf32> to vector<32x1xf32>
    %113 = vector.broadcast %112 : vector<32x1xf32> to vector<32x128xf32>
    %114 = arith.addf %111, %113 : vector<32x128xf32>
    %cst_63 = arith.constant 0.000000e+00 : f32
    %115 = vector.broadcast %cst_63 : f32 to vector<32x128xf32>
    %116 = arith.maximumf %114, %115 : vector<32x128xf32>
    %117 = vector.extract_strided_slice %116 {offsets = [0, 0], sizes = [16, 128], strides = [1, 1]} : vector<32x128xf32> to vector<16x128xf32>
    %118 = arith.truncf %117 : vector<16x128xf32> to vector<16x128xbf16>
    %119 = vector.extract_strided_slice %116 {offsets = [16, 0], sizes = [16, 128], strides = [1, 1]} : vector<32x128xf32> to vector<16x128xf32>
    %cst_64 = arith.constant dense<0.000000e+00> : vector<16x8xf32>
    %120 = tpu.matmul %119, %1, %cst_64 {dimension_numbers = #tpu.dot_dimension_numbers<[1], [0], [0], [1], [0, 0, 1, 1], [], []>} : vector<16x128xf32>, vector<128x8xf32>, vector<16x8xf32> -> vector<16x8xf32>
    %cst_65 = arith.constant dense<0.000000e+00> : vector<16x128xf32>
    %121 = tpu.matmul %120, %2, %cst_65 {dimension_numbers = #tpu.dot_dimension_numbers<[1], [0], [0], [1], [0, 0, 1, 1], [], []>} : vector<16x8xf32>, vector<8x128xf32>, vector<16x128xf32> -> vector<16x128xf32>
    %122 = arith.truncf %121 : vector<16x128xf32> to vector<16x128xbf16>
    %123 = vector.extract_strided_slice %16 {offsets = [160, 0], sizes = [32, 128], strides = [1, 1]} : vector<192x128xf32> to vector<32x128xf32>
    %c5 = arith.constant 5 : index
    %c0_66 = arith.constant 0 : index
    %c0_67 = arith.constant 0 : index
    %124 = vector.load %arg6[%c5, %c0_66, %c0_67] : memref<6x32x16xbf16, #tpu.memory_space<vmem>>, vector<1x32x16xbf16>
    %125 = vector.shape_cast %124 : vector<1x32x16xbf16> to vector<32x16xbf16>
    %cst_68 = arith.constant dense<0.000000e+00> : vector<32x128xf32>
    %126 = tpu.matmul %125, %118, %cst_68 {dimension_numbers = #tpu.dot_dimension_numbers<[1], [0], [0], [1], [0, 0, 1, 1], [], []>} : vector<32x16xbf16>, vector<16x128xbf16>, vector<32x128xf32> -> vector<32x128xf32>
    %127 = arith.addf %123, %126 : vector<32x128xf32>
    %c5_69 = arith.constant 5 : index
    %c0_70 = arith.constant 0 : index
    %c0_71 = arith.constant 0 : index
    %128 = vector.load %arg7[%c5_69, %c0_70, %c0_71] : memref<6x32x16xbf16, #tpu.memory_space<vmem>>, vector<1x32x16xbf16>
    %129 = vector.shape_cast %128 : vector<1x32x16xbf16> to vector<32x16xbf16>
    %cst_72 = arith.constant dense<0.000000e+00> : vector<32x128xf32>
    %130 = tpu.matmul %129, %122, %cst_72 {dimension_numbers = #tpu.dot_dimension_numbers<[1], [0], [0], [1], [0, 0, 1, 1], [], []>} : vector<32x16xbf16>, vector<16x128xbf16>, vector<32x128xf32> -> vector<32x128xf32>
    %131 = arith.addf %127, %130 : vector<32x128xf32>
    %132 = vector.extract_strided_slice %3 {offsets = [0, 6], sizes = [32, 1], strides = [1, 1]} : vector<48x8xf32> to vector<32x1xf32>
    %133 = vector.broadcast %132 : vector<32x1xf32> to vector<32x128xf32>
    %134 = arith.addf %131, %133 : vector<32x128xf32>
    %cst_73 = arith.constant 0.000000e+00 : f32
    %135 = vector.broadcast %cst_73 : f32 to vector<32x128xf32>
    %136 = arith.maximumf %134, %135 : vector<32x128xf32>
    %137 = vector.extract_strided_slice %136 {offsets = [16, 0], sizes = [16, 128], strides = [1, 1]} : vector<32x128xf32> to vector<16x128xf32>
    %cst_74 = arith.constant dense<0.000000e+00> : vector<16x8xf32>
    %138 = tpu.matmul %137, %1, %cst_74 {dimension_numbers = #tpu.dot_dimension_numbers<[1], [0], [0], [1], [0, 0, 1, 1], [], []>} : vector<16x128xf32>, vector<128x8xf32>, vector<16x8xf32> -> vector<16x8xf32>
    %cst_75 = arith.constant dense<0.000000e+00> : vector<16x128xf32>
    %139 = tpu.matmul %138, %2, %cst_75 {dimension_numbers = #tpu.dot_dimension_numbers<[1], [0], [0], [1], [0, 0, 1, 1], [], []>} : vector<16x8xf32>, vector<8x128xf32>, vector<16x128xf32> -> vector<16x128xf32>
    %140 = arith.extf %0 : vector<8x128xbf16> to vector<8x128xf32>
    %141 = vector.broadcast %5 : vector<8x1xf32> to vector<8x128xf32>
    %142 = arith.mulf %141, %140 : vector<8x128xf32>
    %cst_76 = arith.constant dense<0.000000e+00> : vector<128xf32>
    %143 = vector.multi_reduction <add>, %142, %cst_76 [0] : vector<8x128xf32> to vector<128xf32>
    %144 = vector.shape_cast %143 : vector<128xf32> to vector<1x128xf32>
    %145 = vector.extract_strided_slice %136 {offsets = [0, 0], sizes = [16, 128], strides = [1, 1]} : vector<32x128xf32> to vector<16x128xf32>
    %146 = vector.broadcast %6 : vector<16x1xf32> to vector<16x128xf32>
    %147 = arith.mulf %146, %145 : vector<16x128xf32>
    %cst_77 = arith.constant dense<0.000000e+00> : vector<128xf32>
    %148 = vector.multi_reduction <add>, %147, %cst_77 [0] : vector<16x128xf32> to vector<128xf32>
    %149 = vector.shape_cast %148 : vector<128xf32> to vector<1x128xf32>
    %150 = arith.addf %144, %149 : vector<1x128xf32>
    %151 = vector.broadcast %7 : vector<16x1xf32> to vector<16x128xf32>
    %152 = arith.mulf %151, %139 : vector<16x128xf32>
    %cst_78 = arith.constant dense<0.000000e+00> : vector<128xf32>
    %153 = vector.multi_reduction <add>, %152, %cst_78 [0] : vector<16x128xf32> to vector<128xf32>
    %154 = vector.shape_cast %153 : vector<128xf32> to vector<1x128xf32>
    %155 = arith.addf %150, %154 : vector<1x128xf32>
    %156 = vector.broadcast %8 : vector<1x1xf32> to vector<1x128xf32>
    %157 = arith.addf %155, %156 : vector<1x128xf32>
    %c0_79 = arith.constant 0 : index
    %c0_80 = arith.constant 0 : index
    %158 = vector.load %arg9[%c0_79, %c0_80] : memref<1x128xf32, #tpu.memory_space<vmem>>, vector<1x128xf32>
    tpu.vector_store %arg9[%c0_79, %c0_80], %157 {strides = array<i32>} : memref<1x128xf32, #tpu.memory_space<vmem>>, vector<1x128xf32>,
    return
  }
  func.func @transform_0(%arg0: i32) -> (i32, i32) {
    %c0_i32 = arith.constant 0 : i32
    %c0_i32_0 = arith.constant 0 : i32
    return %c0_i32, %arg0 : i32, i32
  }
  func.func @transform_1(%arg0: i32) -> (i32, i32) {
    %c0_i32 = arith.constant 0 : i32
    %c0_i32_0 = arith.constant 0 : i32
    %c0_i32_1 = arith.constant 0 : i32
    return %c0_i32, %c0_i32_0 : i32, i32
  }
  func.func @transform_2(%arg0: i32) -> (i32, i32) {
    %c0_i32 = arith.constant 0 : i32
    %c0_i32_0 = arith.constant 0 : i32
    %c0_i32_1 = arith.constant 0 : i32
    return %c0_i32, %c0_i32_0 : i32, i32
  }
  func.func @transform_3(%arg0: i32) -> (i32, i32) {
    %c0_i32 = arith.constant 0 : i32
    %c0_i32_0 = arith.constant 0 : i32
    %c0_i32_1 = arith.constant 0 : i32
    return %c0_i32, %c0_i32_0 : i32, i32
  }
  func.func @transform_4(%arg0: i32) -> (i32, i32) {
    %c0_i32 = arith.constant 0 : i32
    %c0_i32_0 = arith.constant 0 : i32
    %c0_i32_1 = arith.constant 0 : i32
    return %c0_i32, %c0_i32_0 : i32, i32
  }
  func.func @transform_5(%arg0: i32) -> (i32, i32, i32) {
    %c0_i32 = arith.constant 0 : i32
    %c0_i32_0 = arith.constant 0 : i32
    %c0_i32_1 = arith.constant 0 : i32
    %c0_i32_2 = arith.constant 0 : i32
    return %c0_i32, %c0_i32_0, %c0_i32_1 : i32, i32, i32
  }
  func.func @transform_6(%arg0: i32) -> (i32, i32, i32) {
    %c0_i32 = arith.constant 0 : i32
    %c0_i32_0 = arith.constant 0 : i32
    %c0_i32_1 = arith.constant 0 : i32
    %c0_i32_2 = arith.constant 0 : i32
    return %c0_i32, %c0_i32_0, %c0_i32_1 : i32, i32, i32
  }
  func.func @transform_7(%arg0: i32) -> (i32, i32) {
    %c0_i32 = arith.constant 0 : i32
    %c0_i32_0 = arith.constant 0 : i32
    %c0_i32_1 = arith.constant 0 : i32
    return %c0_i32, %c0_i32_0 : i32, i32
  }
  func.func @transform_8(%arg0: i32) -> (i32, i32) {
    %c0_i32 = arith.constant 0 : i32
    %c0_i32_0 = arith.constant 0 : i32
    return %c0_i32, %arg0 : i32, i32
  }
}

</mosaic_0001>

<bundles_post_ra>
// kernel: risnet_forward.1
= control target key start
LH: loop header
LB: loop body
LE: loop exit
PB: predicated region body
PF: predicated region fallthrough
CT: control target
= control target key end

     0   :  { %s4040_s27 = smov 0   ;;  %s4491_s0 = inlined_call_operand.vmem [shape: bf16[8,256], index: 0, kind: input, shape index: {}]   ;;  %s4492_s1 = inlined_call_operand.vmem [shape: f32[128,8], index: 1, kind: input, shape index: {}]   ;;  %s4493_s2 = inlined_call_operand.vmem [shape: f32[8,128], index: 2, kind: input, shape index: {}]   ;;  %s4494_s3 = inlined_call_operand.vmem [shape: bf16[32,8], index: 3, kind: input, shape index: {}]   ;;  %s4495_s4 = inlined_call_operand.vmem [shape: bf16[192,8], index: 4, kind: input, shape index: {}]   ;;  %s4496_s5 = inlined_call_operand.vmem [shape: bf16[6,32,16], index: 5, kind: input, shape index: {}]   ;;  %s4497_s6 = inlined_call_operand.vmem [shape: bf16[6,32,16], index: 6, kind: input, shape index: {}]   ;;  %s4498_s7 = inlined_call_operand.vmem [shape: f32[48,8], index: 7, kind: input, shape index: {}]   ;;  %s4499_s8 = inlined_call_operand.vmem [shape: f32[1,256], index: 8, kind: output, shape index: {}]  }
   0x1 LB: > { %s2909_s28 = sadd.s32 4294967295, %s3985_s27   ;;  %p2913_p0 = scmp.ge.s32.totalorder %s3985_s27, 1  ;;  %s3985_s27 = sphi %s4040_s27, %s18_s27  }
   0x2   : > { %p261_p1 = scmp.lt.s32.totalorder %s3985_s27, 3 }
   0x4   : > { %p262_p2 = pnand %p2913_p0, %p261_p1 }
   0x5   : > { %p292_p3 = scmp.lt.s32.totalorder (!%p262_p2), %s2909_s28, 1  ;;  %v3936_v0 = vld [vmem:[%s4494_s3] sm:$0xff] (!%p262_p2)   ;;  %vm358_vm0 = vcmask (!%p262_p2), 64512   ;;  %v4056_v1 = vld [vmem:[%s4498_s7 + $0x10] sm:$0xff] (!%p262_p2)  ;;  %vm365_vm1 = vcmask (!%p262_p2), 1043456   ;;  %v3987_v2 = vmov (!%p262_p2), 0  }
   0x6   : > { %265 = sbr.rel (%p262_p2) target bundleno = 4595 (0x11f3), region = 52  ;;  %3248 = vmatprep.mubr.msk.bf16.mxu0 (!%p262_p2), %vm358_vm0, %v3936_v0  ;;  %3920 = vset.pattern.permute.xlu0 (!%p262_p2), %v3987_v2  ;;  %v4062_v3 = vld [vmem:[%s4498_s7 + $0x18] sm:$0xff] (!%p262_p2)  ;;  %v4067_v4 = vld [vmem:[%s4498_s7] sm:$0xff] (!%p262_p2)  ;;  %v3937_v6 = vld [vmem:[%s4494_s3 + $0x8] sm:$0xff] (!%p262_p2)   ;;  %vm843_vm2 = vcmask (!%p262_p2), 130048  }
   0x7   : > { %340 = vperm.xlu0 (!%p262_p2), %3920, %v4056_v1   ;;  %3921 = vset.pattern.permute.xlu1 (!%p262_p2), %v3987_v2  ;;  %v3938_v5 = vld [vmem:[%s4495_s4] sm:$0xff] (!%p262_p2)   ;;  %v4086_v7 = vld [vmem:[%s4498_s7 + $0x8] sm:$0xff] (!%p262_p2)  ;;  %v3940_v11 = vld [vmem:[%s4495_s4 + $0x10] sm:$0xff] (!%p262_p2)  }
   0x8   : > { %330 = vperm.xlu1 (!%p262_p2), %3921, %v4067_v4   ;;  %3254 = vmatprep.mubr.msk.bf16.mxu1 (!%p262_p2), %vm358_vm0, %v3938_v5  ;;  %v3939_v9 = vld [vmem:[%s4495_s4 + $0x8] sm:$0xff] (!%p262_p2)   ;;  %v301_v12 = vld [vmem:[%s4492_s1] sm:$0xff] (!%p262_p2)  ;;  %v303_v14 = vld [vmem:[%s4492_s1 + $0x10] sm:$0xff] (!%p262_p2) }
   0x9   : > { %v302_v13 = vld [vmem:[%s4492_s1 + $0x8] sm:$0xff] (!%p262_p2)  ;;  %v304_v16 = vld [vmem:[%s4492_s1 + $0x18] sm:$0xff] (!%p262_p2)  ;;  %v305_v18 = vld [vmem:[%s4492_s1 + $0x20] sm:$0xff] (!%p262_p2) }
   0xa   : > { %v4110_v15 = vpack.c.bf16 (!%p262_p2), %v302_v13, %v301_v12  ;;  %v4115_v17 = vpack.c.bf16 (!%p262_p2), %v304_v16, %v303_v14  ;;  %v306_v19 = vld [vmem:[%s4492_s1 + $0x28] sm:$0xff] (!%p262_p2)  ;;  %v307_v21 = vld [vmem:[%s4492_s1 + $0x30] sm:$0xff] (!%p262_p2)  ;;  %v308_v22 = vld [vmem:[%s4492_s1 + $0x38] sm:$0xff] (!%p262_p2)  ;;  %v3988_v12 = vmov (!%p262_p2), 1  }
   0xb   : > { %345 = vperm.xlu0 (!%p262_p2), %3920, %v4062_v3   ;;  %v4129_v20 = vpack.c.bf16 (!%p262_p2), %v306_v19, %v305_v18  ;;  %v3941_v23 = vld [vmem:[%s4495_s4 + $0x18] sm:$0xff] (!%p262_p2)   ;;  %v3942_v24 = vld [vmem:[%s4495_s4 + $0x20] sm:$0xff] (!%p262_p2)   ;;  %v4145_v25 = vpack.c.bf16 (!%p262_p2), %v308_v22, %v307_v21  ;;  %v310_v27 = vld [vmem:[%s4492_s1 + $0x48] sm:$0xff] (!%p262_p2) }
   0xc   : > { %335 = vperm.xlu1 (!%p262_p2), %3921, %v4086_v7   ;;  %v309_v26 = vld [vmem:[%s4492_s1 + $0x40] sm:$0xff] (!%p262_p2)  ;;  %v311_v28 = vld [vmem:[%s4492_s1 + $0x50] sm:$0xff] (!%p262_p2)  ;;  %v312_v29 = vld [vmem:[%s4492_s1 + $0x58] sm:$0xff] (!%p262_p2) }
   0xd   : > { %s4501_s28 = smov (!%p292_p3, %s2909_s28), 1  ;;  %v3943_v30 = vld [vmem:[%s4495_s4 + $0x28] sm:$0xff]   ;;  %v4166_v31 = vpack.c.bf16 %v310_v27, %v309_v26  ;;  %v3944_v32 = vld [vmem:[%s4495_s4 + $0x30] sm:$0xff]   ;;  %v313_v33 = vld [vmem:[%s4492_s1 + $0x60] sm:$0xff]  ;;  %v4179_v35 = vpack.c.bf16 %v312_v29, %v311_v28 }
   0xe   : > { %s2914_s15 = sshll.u32 %s4501_s28, 2  ;;  %v314_v34 = vld [vmem:[%s4492_s1 + $0x68] sm:$0xff]  ;;  %v3945_v36 = vld [vmem:[%s4495_s4 + $0x38] sm:$0xff]   ;;  %v3946_v38 = vld [vmem:[%s4495_s4 + $0x40] sm:$0xff]   ;;  %s298_s30 = scalar_lea.vmem %s4499_s8, %s4501_s28 }
   0xf   : > { %s4077_s20 = scalar_lea.vmem %s4491_s0, %s2914_s15  ;;  %v4188_v37 = vpack.c.bf16 %v314_v34, %v313_v33  ;;  %v3947_v39 = vld [vmem:[%s4495_s4 + $0x48] sm:$0xff]   ;;  %v3948_v40 = vld [vmem:[%s4495_s4 + $0x50] sm:$0xff]   ;;  %v3949_v41 = vld [vmem:[%s4495_s4 + $0x58] sm:$0xff]   ;;  %3922 = vset.pattern.permute.xlu0 %v3988_v12 }
  0x10   : > { %v300_v8 = vld [vmem:[%s4077_s20] sm:$0xf]  ;;  %v315_v42 = vld [vmem:[%s4492_s1 + $0x70] sm:$0xff]  ;;  %v316_v43 = vld [vmem:[%s4492_s1 + $0x78] sm:$0xff]  ;;  %3923 = vset.pattern.permute.xlu1 %v3988_v12  ;;  %985 = vperm.xlu0 %3922, %v4056_v1  }
  0x11   : > { %3902 = vmatprep.subr.msk.bf16.mxu0 %vm365_vm1, %v300_v8  ;;  %v367_v10 = vsel %vm365_vm1, %v300_v8, 0  ;;  %3903 = vmatprep.subr.msk.bf16.mxu1 %vm365_vm1, %v300_v8  ;;  %v4216_v44 = vpack.c.bf16 %v316_v43, %v315_v42  ;;  %v4223_v45 = vld [vmem:[%s4493_s2] sm:$0xff]  ;;  %v3953_v19 = vld [vmem:[%s4497_s6 + $0x8] sm:$0xff]  }
  0x12   : > { %3247 = vmatpush3.bf16.msra.mxu0 %v367_v10  ;;  %3253 = vmatpush3.bf16.msra.mxu1 %v367_v10  ;;  %v3950_v8 = vld [vmem:[%s4496_s5] sm:$0xff]   ;;  %v3951_v10 = vld [vmem:[%s4496_s5 + $0x8] sm:$0xff]  }
  0x13   : > { %3631 = vmatprep.subr.bf16.mxu1 %v4110_v15  ;;  %3313 = vmatprep.subr.mxu0 %v4223_v45 }
  0x14   : > { %989 = vperm.xlu1 %3923, %v4062_v3   ;;  %981 = vperm.xlu0 %3922, %v4086_v7  }
  0x15   : > { %3249 = vmatmul.mubr.msk.bf16.vlgmr.msra.gmra.mrb[0].mxu0 %vm358_vm0, %v3937_v6  ;;  %3255 = vmatmul.mubr.msk.bf16.vlgmr.msra.gmra.mrb[0].mxu1 %vm358_vm0, %v3939_v9 }
  0x16   : > { %3258 = vmatprep.mubr.msk.bf16.mxu1 %vm358_vm0, %v3940_v11  ;;  %3633 = vmatpush3.bf16.msra.mxu1 %v4110_v15  ;;  %v3952_v11 = vld [vmem:[%s4497_s6] sm:$0xff]  }
  0x17   : > { %3635 = vmatprep.subr.bf16.mxu1 %v4115_v17  ;;  %3314 = vmatpush3.msra.mxu0 %v4223_v45 }
  0x18   : > { %977 = vperm.xlu1 %3923, %v4067_v4  }
  0x1a   : > { %3637 = vmatpush3.bf16.msra.mxu1 %v4115_v17 }
  0x1b   : > { %3639 = vmatprep.subr.bf16.mxu1 %v4129_v20 }
  0x1d   : > { %3259 = vmatmul.mubr.msk.bf16.gmra.mrb[4].mxu1 %vm358_vm0, %v3941_v23 }
  0x1e   : > { %3262 = vmatprep.mubr.msk.bf16.mxu1 %vm358_vm0, %v3942_v24  ;;  %3641 = vmatpush3.bf16.msra.mxu1 %v4129_v20 }
  0x1f   : > { %3643 = vmatprep.subr.bf16.mxu1 %v4145_v25 }
  0x22   : > { %3645 = vmatpush3.bf16.msra.mxu1 %v4145_v25 }
  0x23   : > { %3647 = vmatprep.subr.bf16.mxu1 %v4166_v31 }
  0x25   : > { %3263 = vmatmul.mubr.msk.bf16.gmra.mrb[8].mxu1 %vm358_vm0, %v3943_v30 }
  0x26   : > { %3266 = vmatprep.mubr.msk.bf16.mxu1 %vm358_vm0, %v3944_v32  ;;  %3649 = vmatpush3.bf16.msra.mxu1 %v4166_v31 }
  0x27   : > { %3651 = vmatprep.subr.bf16.mxu1 %v4179_v35 }
  0x2a   : > { %3653 = vmatpush3.bf16.msra.mxu1 %v4179_v35 }
  0x2b   : > { %3655 = vmatprep.subr.bf16.mxu1 %v4188_v37 }
  0x2d   : > { %3267 = vmatmul.mubr.msk.bf16.gmra.mrb[12].mxu1 %vm358_vm0, %v3945_v36 }
  0x2e   : > { %3270 = vmatprep.mubr.msk.bf16.mxu1 %vm358_vm0, %v3946_v38  ;;  %3657 = vmatpush3.bf16.msra.mxu1 %v4188_v37 }
  0x2f   : > { %3659 = vmatprep.subr.bf16.mxu1 %v4216_v44 }
  0x32   : > { %3661 = vmatpush3.bf16.msra.mxu1 %v4216_v44 }
  0x35   : > { %3271 = vmatmul.mubr.msk.bf16.gmra.mrb[16].mxu1 %vm358_vm0, %v3947_v39 }
  0x36   : > { %3274 = vmatprep.mubr.msk.bf16.mxu1 %vm358_vm0, %v3948_v40 }
  0x3d   : > { %3275 = vmatmul.mubr.msk.bf16.gmra.mrb[20].mxu1 %vm358_vm0, %v3949_v41 }
  0x86   : > { %v341_v46 = vpop.permute.xlu0 %340 }
  0x87   : > { %v331_v47 = vpop.permute.xlu1 %330 }
  0x8a   : > { %v346_v48 = vpop.permute.xlu0 %345 }
  0x8b   : > { %v336_v50 = vpop.permute.xlu1 %335 }
  0x8f   : > { %v986_v30 = vpop.permute.xlu0 %985 }
  0x93   : > { %v990_v29 = vpop.permute.xlu1 %989 }
  0x97   : > { %v978_v36 = vpop.permute.xlu1 %977 }
  0xe8   : > { %v3250_v49 = vpop.f32.mrb[0].mxu0  ;;  %v3256_v53 = vpop.f32.mrb[0].mxu1 }
  0xe9   : > { %v412_v51 = vadd.f32 %v3250_v49, %v341_v46  ;;  %v403_v52 = vpop.f32.mrb[1].mxu0  ;;  %v576_v56 = vpop.f32.mrb[1].mxu1 }
  0xea   : > { %v404_v54 = vadd.f32 %v403_v52, %v331_v47  ;;  %v3251_v55 = vpop.f32.mrb[2].mxu0  ;;  %v3257_v60 = vpop.f32.mrb[2].mxu1 }
  0xeb   : > { %v420_v57 = vmax.f32 %v412_v51, 0.0  ;;  %v415_v58 = vadd.f32 %v3251_v55, %v346_v48  ;;  %v406_v59 = vpop.f32.mrb[3].mxu0  ;;  %v579_v62 = vpop.f32.mrb[3].mxu1 }
  0xec   : > { %v407_v61 = vadd.f32 %v406_v59, %v336_v50  ;;  %v418_v0 = vmax.f32 %v404_v54, 0.0  ;;  %v982_v49 = vpop.permute.xlu0 %981  ;;  %v3956_v59 = vld [vmem:[%s4497_s6 + $0x10] sm:$0xff]  }
  0xed   : > { %v421_v63 = vmax.f32 %v415_v58, 0.0  ;;  %3310 = vmatprep.mubr.f32.mxu1 %v420_v57  ;;  %v3955_v58 = vld [vmem:[%s4496_s5 + $0x18] sm:$0xff]  }
  0xee   : > { %v419_v2 = vmax.f32 %v407_v61, 0.0 }
  0xef   : > { %3311 = vmatmul.mubr.f32.vlgmr.msra.gmra.mrb[24].mxu1 %v421_v63 }
  0xf0   : > { %v671_v5 = vpack.c.bf16 %v419_v2, %v418_v0  ;;  %3326 = vmatprep.mubr.msk.bf16.mxu1 %vm843_vm2, %v3952_v11  ;;  %v3957_v0 = vld [vmem:[%s4497_s6 + $0x18] sm:$0xff]  }
  0xf2   : > { %3318 = vmatprep.subr.bf16.mxu0 %v671_v5 }
 0x1c2   : > { %v3312_v6 = vpop.f32.mrb[24].mxu1 }
 0x1c3   : > { %v738_v9 = vpop.f32.mrb[25].mxu1 }
 0x1c4   : > { %3315 = vmatprep.mubr.msk.f32.mxu0 %vm358_vm0, %v738_v9 }
 0x1c5   : > { %3316 = vmatmul.mubr.msk.f32.vlgmr.msra.gmra.mrb[4].mxu0 %vm358_vm0, %v3312_v6 }
 0x1c6   : > { %3319 = vmatpush3.bf16.msra.mxu0 %v671_v5  ;;  %3320 = vmatprep.mubr.msk.bf16.mxu0 %vm843_vm2, %v3950_v8 }
 0x1c7   : > { %3663 = vmatprep.subr.bf16.mxu0 %v4110_v15 }
 0x1c9   : > { %3321 = vmatmul.mubr.msk.bf16.vlgmr.msra.gmra.mrb[8].mxu0 %vm843_vm2, %v3951_v10 }
 0x1ca   : > { %3665 = vmatpush3.bf16.msra.mxu0 %v4110_v15 }
 0x1cb   : > { %3667 = vmatprep.subr.bf16.mxu0 %v4115_v17 }
 0x1ce   : > { %3669 = vmatpush3.bf16.msra.mxu0 %v4115_v17 }
 0x1cf   : > { %3671 = vmatprep.subr.bf16.mxu0 %v4129_v20 }
 0x1d2   : > { %3673 = vmatpush3.bf16.msra.mxu0 %v4129_v20 }
 0x1d3   : > { %3675 = vmatprep.subr.bf16.mxu0 %v4145_v25 }
 0x1d6   : > { %3677 = vmatpush3.bf16.msra.mxu0 %v4145_v25 }
 0x1d7   : > { %3679 = vmatprep.subr.bf16.mxu0 %v4166_v31 }
 0x1da   : > { %3681 = vmatpush3.bf16.msra.mxu0 %v4166_v31 }
 0x1db   : > { %3683 = vmatprep.subr.bf16.mxu0 %v4179_v35 }
 0x1de   : > { %3685 = vmatpush3.bf16.msra.mxu0 %v4179_v35 }
 0x1df   : > { %3687 = vmatprep.subr.bf16.mxu0 %v4188_v37 }
 0x1e2   : > { %3689 = vmatpush3.bf16.msra.mxu0 %v4188_v37 }
 0x1e3   : > { %3691 = vmatprep.subr.bf16.mxu0 %v4216_v44 }
 0x1e6   : > { %3693 = vmatpush3.bf16.msra.mxu0 %v4216_v44 }
 0x1e7   : > { %3695 = vmatprep.subr.bf16.mxu0 %v4110_v15 }
 0x298   : > { %v3317_v13 = vpop.f32.mrb[4].mxu0 }
 0x299   : > { %v819_v14 = vpop.f32.mrb[5].mxu0 }
 0x29a   : > { %v828_v16 = vpack.c.bf16 %v3317_v13, %v819_v14 }
 0x29c   : > { %v3322_v18 = vpop.f32.mrb[8].mxu0  ;;  %3324 = vmatprep.subr.bf16.mxu1 %v828_v16 }
 0x29d   : > { %v901_v21 = vadd.f32 %v3322_v18, %v3256_v53  ;;  %v884_v22 = vpop.f32.mrb[9].mxu0  ;;  %3325 = vmatpush3.bf16.msra.mxu1 %v828_v16 }
 0x29e   : > { %v899_v23 = vadd.f32 %v884_v22, %v576_v56  ;;  %v3323_v24 = vpop.f32.mrb[10].mxu0  ;;  %3365 = vmatprep.subr.mxu1 %v4223_v45  ;;  %v3954_v56 = vld [vmem:[%s4496_s5 + $0x10] sm:$0xff]  }
 0x29f   : > { %v902_v26 = vadd.f32 %v3323_v24, %v3257_v60  ;;  %v887_v27 = vpop.f32.mrb[11].mxu0  ;;  %v3989_v60 = vmov 2  }
 0x2a0   : > { %v900_v28 = vadd.f32 %v887_v27, %v579_v62  ;;  %3327 = vmatmul.mubr.msk.bf16.vlgmr.msra.gmra.mrb[28].mxu1 %vm843_vm2, %v3953_v19  ;;  %3924 = vset.pattern.permute.xlu1 %v3989_v60  ;;  %v3958_v27 = vld [vmem:[%s4496_s5 + $0x20] sm:$0xff]  }
 0x2a1   : > { %3366 = vmatpush3.msra.mxu1 %v4223_v45  ;;  %3925 = vset.pattern.permute.xlu0 %v3989_v60 }
 0x2a2   : > { %1315 = vperm.xlu1 %3924, %v4056_v1   ;;  %1319 = vperm.xlu0 %3925, %v4062_v3  }
 0x2a6   : > { %1307 = vperm.xlu1 %3924, %v4067_v4  }
 0x2aa   : > { %1311 = vperm.xlu1 %3924, %v4086_v7  }
 0x321   : > { %v1316_v2 = vpop.permute.xlu1 %1315  ;;  %v1320_v8 = vpop.permute.xlu0 %1319 }
 0x325   : > { %v1308_v5 = vpop.permute.xlu1 %1307 }
 0x329   : > { %v1312_v14 = vpop.permute.xlu1 %1311 }
 0x373   : > { %v3328_v32 = vpop.f32.mrb[28].mxu1 }
 0x374   : > { %v974_v33 = vadd.f32 %v3328_v32, %v901_v21  ;;  %v957_v34 = vpop.f32.mrb[29].mxu1  ;;  %v3990_v32 = vmov 3  }
 0x375   : > { %v972_v38 = vadd.f32 %v957_v34, %v899_v23  ;;  %v3329_v39 = vpop.f32.mrb[30].mxu1  ;;  %3926 = vset.pattern.permute.xlu0 %v3990_v32  ;;  %3927 = vset.pattern.permute.xlu1 %v3990_v32 }
 0x376   : > { %v994_v40 = vadd.f32 %v986_v30, %v974_v33  ;;  %v975_v41 = vadd.f32 %v3329_v39, %v902_v26  ;;  %v960_v42 = vpop.f32.mrb[31].mxu1  ;;  %v3960_v30 = vld [vmem:[%s4497_s6 + $0x20] sm:$0xff]   ;;  %1645 = vperm.xlu0 %3926, %v4056_v1   ;;  %1649 = vperm.xlu1 %3927, %v4062_v3  }
 0x377   : > { %v992_v43 = vadd.f32 %v978_v36, %v972_v38  ;;  %v973_v46 = vadd.f32 %v960_v42, %v900_v28  ;;  %v3961_v38 = vld [vmem:[%s4497_s6 + $0x28] sm:$0xff]  }
 0x378   : > { %v998_v47 = vmax.f32 %v994_v40, 0.0  ;;  %v995_v48 = vadd.f32 %v990_v29, %v975_v41  ;;  %v3959_v29 = vld [vmem:[%s4496_s5 + $0x28] sm:$0xff]  }
 0x379   : > { %v993_v50 = vadd.f32 %v982_v49, %v973_v46  ;;  %v996_v52 = vmax.f32 %v992_v43, 0.0 }
 0x37a   : > { %v999_v51 = vmax.f32 %v995_v48, 0.0  ;;  %3362 = vmatprep.mubr.f32.mxu0 %v998_v47  ;;  %1641 = vperm.xlu0 %3926, %v4086_v7  }
 0x37b   : > { %v997_v53 = vmax.f32 %v993_v50, 0.0  ;;  %1637 = vperm.xlu1 %3927, %v4067_v4  }
 0x37c   : > { %3363 = vmatmul.mubr.f32.vlgmr.msra.gmra.mrb[6].mxu0 %v999_v51 }
 0x37d   : > { %v1000_v54 = vpack.c.bf16 %v997_v53, %v996_v52  ;;  %3697 = vmatpush3.bf16.msra.mxu0 %v4110_v15 }
 0x37e   : > { %3699 = vmatprep.subr.bf16.mxu0 %v4115_v17 }
 0x37f   : > { %3370 = vmatprep.subr.bf16.mxu1 %v1000_v54 }
 0x381   : > { %3701 = vmatpush3.bf16.msra.mxu0 %v4115_v17 }
 0x382   : > { %3703 = vmatprep.subr.bf16.mxu0 %v4129_v20 }
 0x385   : > { %3705 = vmatpush3.bf16.msra.mxu0 %v4129_v20 }
 0x386   : > { %3707 = vmatprep.subr.bf16.mxu0 %v4145_v25 }
 0x389   : > { %3709 = vmatpush3.bf16.msra.mxu0 %v4145_v25 }
 0x38a   : > { %3711 = vmatprep.subr.bf16.mxu0 %v4166_v31 }
 0x38d   : > { %3713 = vmatpush3.bf16.msra.mxu0 %v4166_v31 }
 0x38e   : > { %3715 = vmatprep.subr.bf16.mxu0 %v4179_v35 }
 0x391   : > { %3717 = vmatpush3.bf16.msra.mxu0 %v4179_v35 }
 0x392   : > { %3719 = vmatprep.subr.bf16.mxu0 %v4188_v37 }
 0x395   : > { %3721 = vmatpush3.bf16.msra.mxu0 %v4188_v37 }
 0x396   : > { %3723 = vmatprep.subr.bf16.mxu0 %v4216_v44 }
 0x399   : > { %3725 = vmatpush3.bf16.msra.mxu0 %v4216_v44 }
 0x39a   : > { %3469 = vmatprep.subr.mxu0 %v4223_v45 }
 0x3f5   : > { %v1650_v39 = vpop.permute.xlu1 %1649  ;;  %v1646_v40 = vpop.permute.xlu0 %1645 }
 0x3f9   : > { %v1642_v50 = vpop.permute.xlu0 %1641 }
 0x3fa   : > { %v1638_v41 = vpop.permute.xlu1 %1637 }
 0x44f   : > { %v3364_v55 = vpop.f32.mrb[6].mxu0 }
 0x450   : > { %v1067_v57 = vpop.f32.mrb[7].mxu0 }
 0x451   : > { %3367 = vmatprep.mubr.msk.f32.mxu1 %vm358_vm0, %v1067_v57 }
 0x452   : > { %3368 = vmatmul.mubr.msk.f32.vlgmr.msra.gmra.mrb[26].mxu1 %vm358_vm0, %v3364_v55 }
 0x453   : > { %3371 = vmatpush3.bf16.msra.mxu1 %v1000_v54  ;;  %3372 = vmatprep.mubr.msk.bf16.mxu1 %vm843_vm2, %v3954_v56 }
 0x456   : > { %3373 = vmatmul.mubr.msk.bf16.vlgmr.msra.gmra.mrb[4].mxu1 %vm843_vm2, %v3955_v58  ;;  %v3962_v58 = vld [vmem:[%s4496_s5 + $0x30] sm:$0xff]  }
 0x457   : > { %3378 = vmatprep.mubr.msk.bf16.mxu1 %vm843_vm2, %v3956_v59  ;;  %v3963_v59 = vld [vmem:[%s4496_s5 + $0x38] sm:$0xff]  }
 0x525   : > { %v3369_v61 = vpop.f32.mrb[26].mxu1 }
 0x526   : > { %v1148_v62 = vpop.f32.mrb[27].mxu1 }
 0x527   : > { %v1157_v63 = vpack.c.bf16 %v3369_v61, %v1148_v62  ;;  %v3964_v62 = vld [vmem:[%s4497_s6 + $0x30] sm:$0xff]  }
 0x529   : > { %3376 = vmatprep.subr.bf16.mxu1 %v1157_v63 }
 0x52a   : > { %3377 = vmatpush3.bf16.msra.mxu1 %v1157_v63  ;;  %v3991_v63 = vmov 4  }
 0x52b   : > { %3417 = vmatprep.subr.mxu1 %v4223_v45  ;;  %3928 = vset.pattern.permute.xlu1 %v3991_v63 }
 0x52c   : > { %3929 = vset.pattern.permute.xlu0 %v3991_v63  ;;  %1975 = vperm.xlu1 %3928, %v4056_v1   ;;  %v3973_v63 = vld [vmem:[%s4497_s6 + $0x58] sm:$0xff]  }
 0x52d   : > { %3379 = vmatmul.mubr.msk.bf16.vlgmr.msra.gmra.mrb[4].mxu1 %vm843_vm2, %v3957_v0  ;;  %1979 = vperm.xlu0 %3929, %v4062_v3  }
 0x52e   : > { %3418 = vmatpush3.msra.mxu1 %v4223_v45 }
 0x530   : > { %1967 = vperm.xlu1 %3928, %v4067_v4  }
 0x534   : > { %1971 = vperm.xlu1 %3928, %v4086_v7  }
 0x600   : > { %v3380_v6 = vpop.f32.mrb[4].mxu1 }
 0x601   : > { %v1324_v9 = vadd.f32 %v3380_v6, %v1316_v2  ;;  %v1287_v10 = vpop.f32.mrb[5].mxu1  ;;  %v3965_v6 = vld [vmem:[%s4497_s6 + $0x38] sm:$0xff]  }
 0x602   : > { %v1322_v11 = vadd.f32 %v1308_v5, %v1287_v10  ;;  %v3381_v12 = vpop.f32.mrb[6].mxu1 }
 0x603   : > { %v1328_v13 = vmax.f32 %v1324_v9, 0.0  ;;  %v1325_v16 = vadd.f32 %v3381_v12, %v1320_v8  ;;  %v1290_v18 = vpop.f32.mrb[7].mxu1  ;;  %v1976_v8 = vpop.permute.xlu1 %1975 }
 0x604   : > { %v1323_v19 = vadd.f32 %v1312_v14, %v1290_v18  ;;  %v1326_v22 = vmax.f32 %v1322_v11, 0.0  ;;  %v1980_v11 = vpop.permute.xlu0 %1979 }
 0x605   : > { %v1329_v21 = vmax.f32 %v1325_v16, 0.0  ;;  %3414 = vmatprep.mubr.f32.mxu0 %v1328_v13 }
 0x606   : > { %v1327_v23 = vmax.f32 %v1323_v19, 0.0 }
 0x607   : > { %3415 = vmatmul.mubr.f32.vlgmr.msra.gmra.mrb[12].mxu0 %v1329_v21  ;;  %v1968_v9 = vpop.permute.xlu1 %1967 }
 0x608   : > { %v1330_v24 = vpack.c.bf16 %v1327_v23, %v1326_v22  ;;  %3470 = vmatpush3.msra.mxu0 %v4223_v45 }
 0x609   : > { %3759 = vmatprep.subr.bf16.mxu0 %v4110_v15 }
 0x60a   : > { %3422 = vmatprep.subr.bf16.mxu1 %v1330_v24 }
 0x60b   : > { %v1972_v19 = vpop.permute.xlu1 %1971 }
 0x6da   : > { %v3416_v26 = vpop.f32.mrb[12].mxu0 }
 0x6db   : > { %v1397_v28 = vpop.f32.mrb[13].mxu0 }
 0x6dc   : > { %3419 = vmatprep.mubr.msk.f32.mxu1 %vm358_vm0, %v1397_v28 }
 0x6dd   : > { %3420 = vmatmul.mubr.msk.f32.vlgmr.msra.gmra.mrb[32].mxu1 %vm358_vm0, %v3416_v26 }
 0x6de   : > { %3423 = vmatpush3.bf16.msra.mxu1 %v1330_v24  ;;  %3424 = vmatprep.mubr.msk.bf16.mxu1 %vm843_vm2, %v3958_v27 }
 0x6e1   : > { %3425 = vmatmul.mubr.msk.bf16.vlgmr.msra.gmra.mrb[8].mxu1 %vm843_vm2, %v3959_v29  ;;  %v3966_v29 = vld [vmem:[%s4496_s5 + $0x40] sm:$0xff]  }
 0x6e2   : > { %3430 = vmatprep.mubr.msk.bf16.mxu1 %vm843_vm2, %v3960_v30  ;;  %v3967_v30 = vld [vmem:[%s4496_s5 + $0x48] sm:$0xff]  }
 0x7b0   : > { %v3421_v33 = vpop.f32.mrb[32].mxu1 }
 0x7b1   : > { %v1478_v34 = vpop.f32.mrb[33].mxu1 }
 0x7b2   : > { %v1487_v36 = vpack.c.bf16 %v3421_v33, %v1478_v34  ;;  %v3968_v34 = vld [vmem:[%s4497_s6 + $0x40] sm:$0xff]  }
 0x7b4   : > { %3428 = vmatprep.subr.bf16.mxu1 %v1487_v36 }
 0x7b5   : > { %3429 = vmatpush3.bf16.msra.mxu1 %v1487_v36  ;;  %v3992_v36 = vmov 5  }
 0x7b6   : > { %3727 = vmatprep.subr.bf16.mxu1 %v4110_v15  ;;  %3930 = vset.pattern.permute.xlu0 %v3992_v36 }
 0x7b7   : > { %3931 = vset.pattern.permute.xlu1 %v3992_v36  ;;  %2305 = vperm.xlu0 %3930, %v4056_v1  }
 0x7b8   : > { %3431 = vmatmul.mubr.msk.bf16.vlgmr.msra.gmra.mrb[8].mxu1 %vm843_vm2, %v3961_v38  ;;  %2309 = vperm.xlu1 %3931, %v4062_v3  }
 0x7b9   : > { %3729 = vmatpush3.bf16.msra.mxu1 %v4110_v15 }
 0x7ba   : > { %3731 = vmatprep.subr.bf16.mxu1 %v4115_v17 }
 0x7bb   : > { %2301 = vperm.xlu0 %3930, %v4086_v7  }
 0x7bc   : > { %2297 = vperm.xlu1 %3931, %v4067_v4  }
 0x7bd   : > { %3733 = vmatpush3.bf16.msra.mxu1 %v4115_v17 }
 0x7be   : > { %3735 = vmatprep.subr.bf16.mxu1 %v4129_v20 }
 0x7c1   : > { %3737 = vmatpush3.bf16.msra.mxu1 %v4129_v20 }
 0x7c2   : > { %3739 = vmatprep.subr.bf16.mxu1 %v4145_v25 }
 0x7c5   : > { %3741 = vmatpush3.bf16.msra.mxu1 %v4145_v25 }
 0x7c6   : > { %3743 = vmatprep.subr.bf16.mxu1 %v4166_v31 }
 0x7c9   : > { %3745 = vmatpush3.bf16.msra.mxu1 %v4166_v31 }
 0x7ca   : > { %3747 = vmatprep.subr.bf16.mxu1 %v4179_v35 }
 0x7cd   : > { %3749 = vmatpush3.bf16.msra.mxu1 %v4179_v35 }
 0x7ce   : > { %3751 = vmatprep.subr.bf16.mxu1 %v4188_v37 }
 0x7d1   : > { %3753 = vmatpush3.bf16.msra.mxu1 %v4188_v37 }
 0x7d2   : > { %3755 = vmatprep.subr.bf16.mxu1 %v4216_v44 }
 0x7d5   : > { %3757 = vmatpush3.bf16.msra.mxu1 %v4216_v44 }
 0x836   : > { %v2306_v3 = vpop.permute.xlu0 %2305 }
 0x837   : > { %v2310_v1 = vpop.permute.xlu1 %2309 }
 0x83b   : > { %v2298_v7 = vpop.permute.xlu1 %2297 }
 0x88b   : > { %v3432_v42 = vpop.f32.mrb[8].mxu1 }
 0x88c   : > { %v1654_v43 = vadd.f32 %v3432_v42, %v1646_v40  ;;  %v1617_v46 = vpop.f32.mrb[9].mxu1 }
 0x88d   : > { %v1652_v47 = vadd.f32 %v1638_v41, %v1617_v46  ;;  %v3433_v48 = vpop.f32.mrb[10].mxu1  ;;  %v3969_v41 = vld [vmem:[%s4497_s6 + $0x48] sm:$0xff]  }
 0x88e   : > { %v1658_v49 = vmax.f32 %v1654_v43, 0.0  ;;  %v1655_v51 = vadd.f32 %v3433_v48, %v1650_v39  ;;  %v1620_v52 = vpop.f32.mrb[11].mxu1 }
 0x88f   : > { %v1653_v53 = vadd.f32 %v1642_v50, %v1620_v52  ;;  %v1656_v55 = vmax.f32 %v1652_v47, 0.0 }
 0x890   : > { %v1659_v54 = vmax.f32 %v1655_v51, 0.0  ;;  %3466 = vmatprep.mubr.f32.mxu1 %v1658_v49  ;;  %v2302_v49 = vpop.permute.xlu0 %2301 }
 0x891   : > { %v1657_v56 = vmax.f32 %v1653_v53, 0.0 }
 0x892   : > { %3467 = vmatmul.mubr.f32.vlgmr.msra.gmra.mrb[34].mxu1 %v1659_v54 }
 0x893   : > { %v1660_v57 = vpack.c.bf16 %v1657_v56, %v1656_v55  ;;  %3476 = vmatprep.mubr.msk.bf16.mxu1 %vm843_vm2, %v3962_v58  ;;  %v3994_v58 = vmov 7  }
 0x895   : > { %3474 = vmatprep.subr.bf16.mxu1 %v1660_v57 }
 0x896   : > { %3475 = vmatpush3.bf16.msra.mxu1 %v1660_v57  ;;  %v3976_v57 = vld [vmem:[%s4498_s7] sm:$0xff] }
 0x899   : > { %3477 = vmatmul.mubr.msk.bf16.vlgmr.msra.gmra.mrb[12].mxu1 %vm843_vm2, %v3963_v59  ;;  %v3977_v59 = vld [vmem:[%s4498_s7 + $0x8] sm:$0xff] }
 0x89a   : > { %3482 = vmatprep.mubr.msk.bf16.mxu1 %vm843_vm2, %v3964_v62 }
 0x965   : > { %v3468_v60 = vpop.f32.mrb[34].mxu1 }
 0x966   : > { %v1727_v61 = vpop.f32.mrb[35].mxu1 }
 0x967   : > { %3471 = vmatprep.mubr.msk.f32.mxu0 %vm358_vm0, %v1727_v61 }
 0x968   : > { %3472 = vmatmul.mubr.msk.f32.vlgmr.msra.gmra.mrb[14].mxu0 %vm358_vm0, %v3468_v60 }
 0x969   : > { %3761 = vmatpush3.bf16.msra.mxu0 %v4110_v15 }
 0x96a   : > { %3763 = vmatprep.subr.bf16.mxu0 %v4115_v17 }
 0x96d   : > { %3765 = vmatpush3.bf16.msra.mxu0 %v4115_v17 }
 0x96e   : > { %3767 = vmatprep.subr.bf16.mxu0 %v4129_v20 }
 0x971   : > { %3769 = vmatpush3.bf16.msra.mxu0 %v4129_v20 }
 0x972   : > { %3771 = vmatprep.subr.bf16.mxu0 %v4145_v25 }
 0x975   : > { %3773 = vmatpush3.bf16.msra.mxu0 %v4145_v25 }
 0x976   : > { %3775 = vmatprep.subr.bf16.mxu0 %v4166_v31 }
 0x979   : > { %3777 = vmatpush3.bf16.msra.mxu0 %v4166_v31 }
 0x97a   : > { %3779 = vmatprep.subr.bf16.mxu0 %v4179_v35 }
 0x97d   : > { %3781 = vmatpush3.bf16.msra.mxu0 %v4179_v35 }
 0x97e   : > { %3783 = vmatprep.subr.bf16.mxu0 %v4188_v37 }
 0x981   : > { %3785 = vmatpush3.bf16.msra.mxu0 %v4188_v37 }
 0x982   : > { %3787 = vmatprep.subr.bf16.mxu0 %v4216_v44 }
 0x985   : > { %3789 = vmatpush3.bf16.msra.mxu0 %v4216_v44 }
 0x986   : > { %3521 = vmatprep.subr.mxu0 %v4223_v45 }
 0xa3b   : > { %v3473_v0 = vpop.f32.mrb[14].mxu0 }
 0xa3c   : > { %v1808_v2 = vpop.f32.mrb[15].mxu0 }
 0xa3d   : > { %v1817_v5 = vpack.c.bf16 %v3473_v0, %v1808_v2 }
 0xa3f   : > { %3480 = vmatprep.subr.bf16.mxu1 %v1817_v5 }
 0xa40   : > { %3481 = vmatpush3.bf16.msra.mxu1 %v1817_v5 }
 0xa43   : > { %3483 = vmatmul.mubr.msk.bf16.vlgmr.msra.gmra.mrb[12].mxu1 %vm843_vm2, %v3965_v6 }
 0xa44   : > { %3528 = vmatprep.mubr.msk.bf16.mxu1 %vm843_vm2, %v3966_v29  ;;  %v323_v29 = vld [vmem:[%s4498_s7 + $0x28] sm:$0xff] }
 0xb16   : > { %v3484_v10 = vpop.f32.mrb[12].mxu1 }
 0xb17   : > { %v1984_v12 = vadd.f32 %v3484_v10, %v1976_v8  ;;  %v1947_v13 = vpop.f32.mrb[13].mxu1 }
 0xb18   : > { %v1982_v14 = vadd.f32 %v1968_v9, %v1947_v13  ;;  %v3485_v16 = vpop.f32.mrb[14].mxu1 }
 0xb19   : > { %v1988_v18 = vmax.f32 %v1984_v12, 0.0  ;;  %v1985_v21 = vadd.f32 %v3485_v16, %v1980_v11  ;;  %v1950_v22 = vpop.f32.mrb[15].mxu1 }
 0xb1a   : > { %v1983_v23 = vadd.f32 %v1972_v19, %v1950_v22  ;;  %v1986_v26 = vmax.f32 %v1982_v14, 0.0 }
 0xb1b   : > { %v1989_v24 = vmax.f32 %v1985_v21, 0.0  ;;  %3518 = vmatprep.mubr.f32.mxu0 %v1988_v18 }
 0xb1c   : > { %v1987_v27 = vmax.f32 %v1983_v23, 0.0 }
 0xb1d   : > { %3519 = vmatmul.mubr.f32.vlgmr.msra.gmra.mrb[16].mxu0 %v1989_v24 }
 0xb1e   : > { %v1990_v28 = vpack.c.bf16 %v1987_v27, %v1986_v26  ;;  %3522 = vmatpush3.msra.mxu0 %v4223_v45 }
 0xb1f   : > { %3791 = vmatprep.subr.bf16.mxu0 %v4110_v15 }
 0xb20   : > { %3526 = vmatprep.subr.bf16.mxu1 %v1990_v28 }
 0xb21   : > { %3527 = vmatpush3.bf16.msra.mxu1 %v1990_v28  ;;  %v322_v28 = vld [vmem:[%s4498_s7 + $0x20] sm:$0xff] }
 0xb24   : > { %3529 = vmatmul.mubr.msk.bf16.vlgmr.msra.gmra.mrb[16].mxu1 %vm843_vm2, %v3967_v30 }
 0xb25   : > { %3534 = vmatprep.mubr.msk.bf16.mxu1 %vm843_vm2, %v3968_v34 }
 0xbf0   : > { %v3520_v32 = vpop.f32.mrb[16].mxu0 }
 0xbf1   : > { %v2057_v33 = vpop.f32.mrb[17].mxu0 }
 0xbf2   : > { %3523 = vmatprep.mubr.msk.f32.mxu0 %vm358_vm0, %v2057_v33  ;;  %v3978_v33 = vld [vmem:[%s4077_s20] sm:$0xf] }
 0xbf3   : > { %3524 = vmatmul.mubr.msk.f32.vlgmr.msra.gmra.mrb[18].mxu0 %vm358_vm0, %v3520_v32  ;;  %v2806_v34 = vunpack.c.l.bf16 %v3978_v33 }
 0xbf4   : > { %3793 = vmatpush3.bf16.msra.mxu0 %v4110_v15 }
 0xbf5   : > { %3795 = vmatprep.subr.bf16.mxu0 %v4115_v17 }
 0xbf8   : > { %3797 = vmatpush3.bf16.msra.mxu0 %v4115_v17 }
 0xbf9   : > { %3799 = vmatprep.subr.bf16.mxu0 %v4129_v20 }
 0xbfc   : > { %3801 = vmatpush3.bf16.msra.mxu0 %v4129_v20 }
 0xbfd   : > { %3803 = vmatprep.subr.bf16.mxu0 %v4145_v25 }
 0xc00   : > { %3805 = vmatpush3.bf16.msra.mxu0 %v4145_v25 }
 0xc01   : > { %3807 = vmatprep.subr.bf16.mxu0 %v4166_v31 }
 0xc04   : > { %3809 = vmatpush3.bf16.msra.mxu0 %v4166_v31 }
 0xc05   : > { %3811 = vmatprep.subr.bf16.mxu0 %v4179_v35 }
 0xc08   : > { %3813 = vmatpush3.bf16.msra.mxu0 %v4179_v35 }
 0xc09   : > { %3815 = vmatprep.subr.bf16.mxu0 %v4188_v37 }
 0xc0c   : > { %3817 = vmatpush3.bf16.msra.mxu0 %v4188_v37 }
 0xc0d   : > { %3819 = vmatprep.subr.bf16.mxu0 %v4216_v44 }
 0xc10   : > { %3821 = vmatpush3.bf16.msra.mxu0 %v4216_v44 }
 0xc11   : > { %3823 = vmatprep.subr.bf16.mxu0 %v4110_v15 }
 0xcc6   : > { %v3525_v38 = vpop.f32.mrb[18].mxu0 }
 0xcc7   : > { %v2138_v39 = vpop.f32.mrb[19].mxu0 }
 0xcc8   : > { %v2147_v40 = vpack.c.bf16 %v3525_v38, %v2138_v39 }
 0xcca   : > { %3532 = vmatprep.subr.bf16.mxu1 %v2147_v40 }
 0xccb   : > { %3533 = vmatpush3.bf16.msra.mxu1 %v2147_v40 }
 0xccc   : > { %3573 = vmatprep.subr.mxu1 %v4223_v45 }
 0xcce   : > { %3535 = vmatmul.mubr.msk.bf16.vlgmr.msra.gmra.mrb[16].mxu1 %vm843_vm2, %v3969_v41 }
 0xccf   : > { %3574 = vmatpush3.msra.mxu1 %v4223_v45 }
 0xda1   : > { %v3536_v42 = vpop.f32.mrb[16].mxu1 }
 0xda2   : > { %v2314_v4 = vadd.f32 %v3536_v42, %v2306_v3  ;;  %v2277_v43 = vpop.f32.mrb[17].mxu1 }
 0xda3   : > { %v2312_v46 = vadd.f32 %v2298_v7, %v2277_v43  ;;  %v3537_v47 = vpop.f32.mrb[18].mxu1 }
 0xda4   : > { %v2318_v48 = vmax.f32 %v2314_v4, 0.0  ;;  %v2315_v50 = vadd.f32 %v3537_v47, %v2310_v1  ;;  %v2280_v51 = vpop.f32.mrb[19].mxu1 }
 0xda5   : > { %v2313_v52 = vadd.f32 %v2302_v49, %v2280_v51  ;;  %v2316_v54 = vmax.f32 %v2312_v46, 0.0 }
 0xda6   : > { %v2319_v53 = vmax.f32 %v2315_v50, 0.0  ;;  %3570 = vmatprep.mubr.f32.mxu0 %v2318_v48 }
 0xda7   : > { %v2317_v55 = vmax.f32 %v2313_v52, 0.0 }
 0xda8   : > { %3571 = vmatmul.mubr.f32.vlgmr.msra.gmra.mrb[20].mxu0 %v2319_v53 }
 0xda9   : > { %v2320_v56 = vpack.c.bf16 %v2317_v55, %v2316_v54  ;;  %3825 = vmatpush3.bf16.msra.mxu0 %v4110_v15 }
 0xdaa   : > { %3827 = vmatprep.subr.bf16.mxu0 %v4115_v17 }
 0xdab   : > { %3578 = vmatprep.subr.bf16.mxu1 %v2320_v56 }
 0xdad   : > { %3829 = vmatpush3.bf16.msra.mxu0 %v4115_v17  ;;  %v3970_v17 = vld [vmem:[%s4496_s5 + $0x50] sm:$0xff]  }
 0xdae   : > { %3831 = vmatprep.subr.bf16.mxu0 %v4129_v20 }
 0xdb1   : > { %3833 = vmatpush3.bf16.msra.mxu0 %v4129_v20 }
 0xdb2   : > { %3835 = vmatprep.subr.bf16.mxu0 %v4145_v25 }
 0xdb5   : > { %3837 = vmatpush3.bf16.msra.mxu0 %v4145_v25  ;;  %v3971_v25 = vld [vmem:[%s4496_s5 + $0x58] sm:$0xff]  }
 0xdb6   : > { %3839 = vmatprep.subr.bf16.mxu0 %v4166_v31 }
 0xdb9   : > { %3841 = vmatpush3.bf16.msra.mxu0 %v4166_v31  ;;  %v3972_v31 = vld [vmem:[%s4497_s6 + $0x50] sm:$0xff]  }
 0xdba   : > { %3843 = vmatprep.subr.bf16.mxu0 %v4179_v35 }
 0xdbd   : > { %3845 = vmatpush3.bf16.msra.mxu0 %v4179_v35  ;;  %v3993_v35 = vmov 6  }
 0xdbe   : > { %3847 = vmatprep.subr.bf16.mxu0 %v4188_v37  ;;  %3932 = vset.pattern.permute.xlu1 %v3993_v35 }
 0xdbf   : > { %3933 = vset.pattern.permute.xlu0 %v3993_v35 }
 0xdc1   : > { %3849 = vmatpush3.bf16.msra.mxu0 %v4188_v37  ;;  %v3974_v37 = vld [vmem:[%s4498_s7 + $0x10] sm:$0xff] }
 0xdc2   : > { %3851 = vmatprep.subr.bf16.mxu0 %v4216_v44  ;;  %2635 = vperm.xlu1 %3932, %v3974_v37  }
 0xdc5   : > { %3853 = vmatpush3.bf16.msra.mxu0 %v4216_v44  ;;  %v3975_v44 = vld [vmem:[%s4498_s7 + $0x18] sm:$0xff] }
 0xdc6   : > { %2639 = vperm.xlu0 %3933, %v3975_v44   ;;  %2627 = vperm.xlu1 %3932, %v3976_v57  }
 0xdca   : > { %3934 = vset.pattern.permute.xlu0 %v3994_v58  ;;  %2631 = vperm.xlu1 %3932, %v3977_v59  }
 0xdcb   : > { %2819 = vperm.xlu0 %3934, %v3977_v59  }
 0xdce   : > { %3935 = vset.pattern.permute.xlu1 %v3994_v58 }
 0xdcf   : > { %2837 = vperm.xlu0 %3934, %v3975_v44   ;;  %2823 = vperm.xlu1 %3935, %v3974_v37  }
 0xdd3   : > { %2808 = vperm.xlu1 %3935, %v3976_v57   ;;  %2857 = vperm.xlu0 %3934, %v323_v29  }
 0xdd7   : > { %2842 = vperm.xlu1 %3935, %v322_v28  }
 0xe41   : > { %v2636_v0 = vpop.permute.xlu1 %2635 }
 0xe45   : > { %v2628_v2 = vpop.permute.xlu1 %2627  ;;  %v2640_v5 = vpop.permute.xlu0 %2639 }
 0xe49   : > { %v2632_v9 = vpop.permute.xlu1 %2631 }
 0xe4a   : > { %v2820_v22 = vpop.permute.xlu0 %2819 }
 0xe4e   : > { %v2838_v46 = vpop.permute.xlu0 %2837 }
 0xe52   : > { %v2858_v44 = vpop.permute.xlu0 %2857 }
 0xe7b   : > { %v3572_v15 = vpop.f32.mrb[20].mxu0 }
 0xe7c   : > { %v2387_v20 = vpop.f32.mrb[21].mxu0 }
 0xe7d   : > { %3575 = vmatprep.mubr.msk.f32.mxu1 %vm358_vm0, %v2387_v20 }
 0xe7e   : > { %3576 = vmatmul.mubr.msk.f32.vlgmr.msra.gmra.mrb[36].mxu1 %vm358_vm0, %v3572_v15 }
 0xe7f   : > { %3579 = vmatpush3.bf16.msra.mxu1 %v2320_v56  ;;  %3580 = vmatprep.mubr.msk.bf16.mxu1 %vm843_vm2, %v3970_v17 }
 0xe82   : > { %3581 = vmatmul.mubr.msk.bf16.vlgmr.msra.gmra.mrb[20].mxu1 %vm843_vm2, %v3971_v25 }
 0xe83   : > { %3586 = vmatprep.mubr.msk.bf16.mxu1 %vm843_vm2, %v3972_v31 }
 0xf51   : > { %v3577_v60 = vpop.f32.mrb[36].mxu1 }
 0xf52   : > { %v2468_v61 = vpop.f32.mrb[37].mxu1 }
 0xf53   : > { %v2477_v62 = vpack.c.bf16 %v3577_v60, %v2468_v61 }
 0xf55   : > { %3584 = vmatprep.subr.bf16.mxu1 %v2477_v62 }
 0xf56   : > { %3585 = vmatpush3.bf16.msra.mxu1 %v2477_v62 }
 0xf57   : > { %3625 = vmatprep.subr.mxu1 %v4223_v45 }
 0xf59   : > { %3587 = vmatmul.mubr.msk.bf16.vlgmr.msra.gmra.mrb[20].mxu1 %vm843_vm2, %v3973_v63 }
 0xf5a   : > { %3626 = vmatpush3.msra.mxu1 %v4223_v45  ;;  %v2824_v45 = vpop.permute.xlu1 %2823 }
 0xf5e   : > { %v2809_v36 = vpop.permute.xlu1 %2808 }
 0xf5f   : > { %v2811_v38 = vmul.f32 %v2809_v36, %v2806_v34 }
 0xf61   : > { %v2812_v40 = vrot.slane %v2811_v38, 4 }
 0xf62   : > { %v2843_v42 = vpop.permute.xlu1 %2842 }
 0xf63   : > { %v2813_v1 = vadd.f32 %v2812_v40, %v2811_v38 }
 0xf65   : > { %v2814_v7 = vrot.slane %v2813_v1, 2 }
 0xf67   : > { %v2815_v50 = vadd.f32 %v2814_v7, %v2813_v1 }
 0xf69   : > { %v2816_v53 = vrot.slane %v2815_v50, 1 }
 0xf6b   : > { %v2817_v15 = vadd.f32 %v2816_v53, %v2815_v50 }
0x102c   : > { %v3588_v6 = vpop.f32.mrb[20].mxu1 }
0x102d   : > { %v2644_v8 = vadd.f32 %v3588_v6, %v2636_v0  ;;  %v2607_v10 = vpop.f32.mrb[21].mxu1 }
0x102e   : > { %v2642_v11 = vadd.f32 %v2628_v2, %v2607_v10  ;;  %v3589_v12 = vpop.f32.mrb[22].mxu1 }
0x102f   : > { %v2648_v13 = vmax.f32 %v2644_v8, 0.0  ;;  %v2645_v14 = vadd.f32 %v3589_v12, %v2640_v5  ;;  %v2610_v16 = vpop.f32.mrb[23].mxu1 }
0x1030   : > { %v2646_v18 = vmax.f32 %v2642_v11, 0.0  ;;  %v2643_v19 = vadd.f32 %v2632_v9, %v2610_v16 }
0x1031   : > { %v2649_v21 = vmax.f32 %v2645_v14, 0.0  ;;  %3622 = vmatprep.mubr.f32.mxu0 %v2648_v13 }
0x1032   : > { %v2647_v23 = vmax.f32 %v2643_v19, 0.0  ;;  %v2826_v24 = vmul.f32 %v2820_v22, %v2646_v18 }
0x1033   : > { %3623 = vmatmul.mubr.f32.vlgmr.msra.gmra.mrb[22].mxu0 %v2649_v21 }
0x1034   : > { %v2827_v26 = vmul.f32 %v2824_v45, %v2647_v23 }
0x1036   : > { %v2828_v27 = vadd.f32 %v2827_v26, %v2826_v24 }
0x1038   : > { %v2829_v39 = vrot.slane %v2828_v27, 4 }
0x103a   : > { %v2830_v41 = vadd.f32 %v2829_v39, %v2828_v27 }
0x103c   : > { %v2831_v3 = vrot.slane %v2830_v41, 2 }
0x103e   : > { %v2832_v49 = vadd.f32 %v2831_v3, %v2830_v41 }
0x1040   : > { %v2833_v55 = vrot.slane %v2832_v49, 1 }
0x1042   : > { %v2834_v17 = vadd.f32 %v2833_v55, %v2832_v49 }
0x1044   : > { %v2835_v31 = vadd.f32 %v2834_v17, %v2817_v15 }
0x1106   : > { %v3624_v30 = vpop.f32.mrb[22].mxu0 }
0x1107   : > { %v2716_v32 = vpop.f32.mrb[23].mxu0 }
0x1108   : > { %3627 = vmatprep.mubr.msk.f32.mxu1 %vm358_vm0, %v2716_v32 }
0x1109   : > { %3628 = vmatmul.mubr.msk.f32.vlgmr.msra.gmra.mrb[38].mxu1 %vm358_vm0, %v3624_v30 }
0x11dc   : > { %v3629_v4 = vpop.f32.mrb[38].mxu1 }
0x11dd   : > { %v2846_v43 = vmul.f32 %v3629_v4, %v2843_v42  ;;  %v2797_v47 = vpop.f32.mrb[39].mxu1 }
0x11de   : > { %v2845_v48 = vmul.f32 %v2838_v46, %v2797_v47 }
0x11e0   : > { %v2847_v51 = vadd.f32 %v2846_v43, %v2845_v48 }
0x11e2   : > { %v2848_v52 = vrot.slane %v2847_v51, 4 }
0x11e4   : > { %v2849_v54 = vadd.f32 %v2848_v52, %v2847_v51 }
0x11e6   : > { %v2850_v56 = vrot.slane %v2849_v54, 2 }
0x11e8   : > { %v2851_v20 = vadd.f32 %v2850_v56, %v2849_v54 }
0x11ea   : > { %v2852_v25 = vrot.slane %v2851_v20, 1 }
0x11ec   : > { %v2853_v35 = vadd.f32 %v2852_v25, %v2851_v20 }
0x11ee   : > { %v2854_v37 = vadd.f32 %v2853_v35, %v2835_v31 }
0x11f0   : > { %v2860_v57 = vadd.f32 %v2858_v44, %v2854_v37 }
0x11f2   : > { %2861 = vst [vmem:[%s298_s30] sm:$0x1] %v2860_v57 }
0x11f3 PF: > { %s18_s27 = sadd.s32 1, %s3985_s27  }
0x11f4   : > { %p15_p4 = scmp.ge.s32.totalorder %s18_s27, 4  }
0x11f6   :  { %17 = sbr.rel (!%p15_p4) target bundleno = 1 (0x1), region = 92 }

</bundles_post_ra>
